<compile_context>
chip_gen: v7x
topology: tpu7x:2x2x1
jax: 0.10.0
libtpu: 0.0.40
codegen_flags: <defaults>
</compile_context>

<pallas_src>
import functools

import jax
import jax.numpy as jnp
from jax.experimental import pallas as pl
from jax.experimental.pallas import tpu as pltpu

_LANE = 128
_SUBLANE = 8


def _round_up(x, m):
    return ((x + m - 1) // m) * m


def _tpu_hw():
    """Best-effort hardware introspection: (vmem_capacity_bytes, mxu_is_256, vpu_has_bf16)."""
    kind = ""
    try:
        kind = jax.devices()[0].device_kind.lower()
    except Exception:
        pass
    vmem_cap = 0
    try:
        vmem_cap = int(pltpu.get_tpu_info().vmem_capacity_bytes)
    except Exception:
        vmem_cap = 0
    if vmem_cap <= 0:
        if "v7" in kind:
            vmem_cap = 64 << 20          # v7x: 64 MiB per TensorCore
        elif kind:
            vmem_cap = 128 << 20         # v2..v6: 128 MiB
        else:
            vmem_cap = 64 << 20          # unknown -> be v7x-safe
    mxu256 = ("v6" in kind) or ("v7" in kind)
    vpu_bf16 = mxu256                    # v6e/v7x VPUs have bf16 VALUs; v5e does not
    return vmem_cap, mxu256, vpu_bf16


def _pad_dim(d, mxu256):
    # v6e/v7x MXUs are 2x256x256: 256-align wide dims; keep 128 for small dims and v5e.
    if mxu256 and d >= 256:
        return _round_up(d, 256)
    return _round_up(d, _LANE)


# --------------------------------------------------------------------------------------
# Fused path: all (padded) weights/biases VMEM-resident, grid over batch tiles only.
# --------------------------------------------------------------------------------------
def _mlp_fused_kernel(n_layer, pdims, compute_dtype, relu_dtype, x_ref, *refs):
    """refs = (w0, b0, w1, b1, ..., w_{L-1}, b_{L-1}, out_ref, h_scratch)."""
    h_ref = refs[-1]       # VMEM scratch, f32, (tile_n, max_hidden_pdim)
    out_ref = refs[-2]
    wb = refs[:-2]
    assert len(wb) == 2 * n_layer

    # Layer 0: h = x @ w0 + b0  (MXU in compute_dtype, f32 accumulation; bias add in f32)
    r = jnp.dot(x_ref[...], wb[0][...], preferred_element_type=jnp.float32) + wb[1][...]
    if n_layer == 1:
        out_ref[...] = r.astype(out_ref.dtype)
        return
    h_ref[:, : pdims[1]] = r

    for i in range(1, n_layer):
        din = pdims[i]
        # norm=None and dropout(eval) are identity; ReLU in relu_dtype (bf16 on v6e/v7x).
        a = jnp.maximum(h_ref[:, :din].astype(relu_dtype), 0).astype(compute_dtype)
        r = jnp.dot(a, wb[2 * i][...], preferred_element_type=jnp.float32) + wb[2 * i + 1][...]
        if i == n_layer - 1:
            out_ref[...] = r.astype(out_ref.dtype)
        else:
            h_ref[:, : pdims[i + 1]] = r


def _fused_forward(xp, params, pdims, n_layer, compute_dtype, relu_dtype, out_dtype,
                   tile_n, n_pad, vmem_cap, single_buffer_params):
    c_i = jnp.dtype(compute_dtype).itemsize
    o_i = jnp.dtype(out_dtype).itemsize
    max_h = max(pdims[1:-1]) if n_layer >= 2 else pdims[-1]
    grid_n = n_pad // tile_n

    # VMEM budget: resident params (+ buffering) + pipelined x/out tiles + f32 h scratch
    # + a compute-dtype copy of h feeding the MXU + compiler-temp headroom.
    param_bufs = 1 if single_buffer_params else 2
    resident = param_bufs * sum(a.size * a.dtype.itemsize for a in params)
    act_bytes = (2 * tile_n * pdims[0] * c_i
                 + 2 * tile_n * pdims[-1] * o_i
                 + tile_n * max_h * 4
                 + tile_n * max_h * c_i)
    vmem_limit = int(min(vmem_cap, resident + act_bytes + (4 << 20)))

    in_specs = [pl.BlockSpec((tile_n, pdims[0]), lambda i: (i, 0))]
    for a in params:
        if single_buffer_params:
            # Constant index map -> block never changes; single-buffer to halve resident VMEM.
            spec = pl.BlockSpec(a.shape, lambda i: (0, 0), pipeline_mode=pl.Buffered(1))
        else:
            spec = pl.BlockSpec(a.shape, lambda i: (0, 0))
        in_specs.append(spec)

    flops = int(2 * n_pad * sum(pdims[i] * pdims[i + 1] for i in range(n_layer)))
    bytes_accessed = int(xp.size * xp.dtype.itemsize
                         + sum(a.size * a.dtype.itemsize for a in params)
                         + n_pad * pdims[-1] * o_i)
    cost = pl.CostEstimate(flops=flops, transcendentals=0, bytes_accessed=bytes_accessed)

    kernel = functools.partial(_mlp_fused_kernel, n_layer, tuple(pdims),
                               compute_dtype, relu_dtype)

    return pl.pallas_call(
        kernel,
        out_shape=jax.ShapeDtypeStruct((n_pad, pdims[-1]), out_dtype),
        grid_spec=pltpu.PrefetchScalarGridSpec(
            num_scalar_prefetch=0,
            grid=(grid_n,),
            in_specs=in_specs,
            out_specs=pl.BlockSpec((tile_n, pdims[-1]), lambda i: (i, 0)),
            scratch_shapes=[pltpu.VMEM((tile_n, max_h), jnp.float32)],
        ),
        compiler_params=pltpu.CompilerParams(
            dimension_semantics=("parallel",),      # shard batch tiles across TCs on v7x
            vmem_limit_bytes=vmem_limit,
        ),
        cost_estimate=cost,
    )(xp, *params)


# --------------------------------------------------------------------------------------
# Per-layer fallback: feature/K-tiled matmul kernels when weights don't fit VMEM (v7x).
# --------------------------------------------------------------------------------------
def _linear_kernel(relu_input, compute_dtype, relu_dtype, x_ref, w_ref, b_ref, o_ref, acc_ref):
    k = pl.program_id(2)

    @pl.when(k == 0)
    def _():
        acc_ref[...] = jnp.zeros_like(acc_ref)

    a = x_ref[...]
    if relu_input:
        a = jnp.maximum(a.astype(relu_dtype), 0)
    acc_ref[...] += jnp.dot(a.astype(compute_dtype), w_ref[...],
                            preferred_element_type=jnp.float32)

    @pl.when(k == pl.num_programs(2) - 1)
    def _():
        o_ref[...] = (acc_ref[...] + b_ref[...]).astype(o_ref.dtype)


def _pick_divisor_tile(dim, max_tile=512):
    t = max(_LANE, (min(dim, max_tile) // _LANE) * _LANE)
    while dim % t:
        t -= _LANE
    return t


def _linear_pallas(x, w, b, *, relu_input, out_dtype, compute_dtype, relu_dtype, tm, vmem_cap):
    M, K = x.shape
    Nf = w.shape[1]
    tk = _pick_divisor_tile(K)
    tn = _pick_divisor_tile(Nf)
    grid = (M // tm, Nf // tn, K // tk)

    c_i = jnp.dtype(compute_dtype).itemsize
    o_i = jnp.dtype(out_dtype).itemsize
    vmem_limit = int(min(vmem_cap,
                         2 * (tm * tk * x.dtype.itemsize + tk * tn * c_i + tn * 4
                              + tm * tn * o_i) + tm * tn * 4 + (4 << 20)))

    kernel = functools.partial(_linear_kernel, relu_input, compute_dtype, relu_dtype)
    return pl.pallas_call(
        kernel,
        out_shape=jax.ShapeDtypeStruct((M, Nf), out_dtype),
        grid_spec=pltpu.PrefetchScalarGridSpec(
            num_scalar_prefetch=0,
            grid=grid,
            in_specs=[
                pl.BlockSpec((tm, tk), lambda i, j, k: (i, k)),
                pl.BlockSpec((tk, tn), lambda i, j, k: (k, j)),
                pl.BlockSpec((1, tn), lambda i, j, k: (0, j)),
            ],
            out_specs=pl.BlockSpec((tm, tn), lambda i, j, k: (i, j)),
            scratch_shapes=[pltpu.VMEM((tm, tn), jnp.float32)],
        ),
        compiler_params=pltpu.CompilerParams(
            dimension_semantics=("parallel", "parallel", "arbitrary"),
            vmem_limit_bytes=vmem_limit,
        ),
    )(x, w, b)


# --------------------------------------------------------------------------------------
# Public wrapper
# --------------------------------------------------------------------------------------
def mlp_forward(x, weights, biases, *, compute_dtype=jnp.bfloat16, out_dtype=None,
                tile_n=None, force_per_layer=False):
    """x: [N, input_dim]; weights[i]: [in_i, out_i]; biases[i]: [1, out_i] (or [out_i])."""
    n_layer = len(weights)
    N, in_dim = x.shape
    out_dim = weights[-1].shape[1]
    compute_dtype = jnp.dtype(compute_dtype)
    out_dtype = jnp.dtype(jnp.float32 if out_dtype is None else out_dtype)

    vmem_cap_phys, mxu256, vpu_bf16 = _tpu_hw()
    vmem_cap = int(0.85 * vmem_cap_phys)            # headroom for compiler temps
    relu_dtype = compute_dtype if (compute_dtype == jnp.bfloat16 and vpu_bf16) else jnp.float32

    # ---- lane/MXU-dense padding of every feature dim (exact, zero padding) ----
    dims = [in_dim] + [w.shape[1] for w in weights]
    pdims = [_pad_dim(d, mxu256) for d in dims]

    # ---- pad + cast operands ----
    params = []
    for li, (w, b) in enumerate(zip(weights, biases)):
        wp = jnp.pad(w, ((0, pdims[li] - w.shape[0]), (0, pdims[li + 1] - w.shape[1])))
        bp = jnp.pad(jnp.reshape(b, (1, -1)), ((0, 0), (0, pdims[li + 1] - w.shape[1])))
        params.append(wp.astype(compute_dtype))     # compute-dtype weights: halve VMEM/DMA bytes
        params.append(bp.astype(jnp.float32))       # bias add stays f32
    param_bytes = sum(a.size * a.dtype.itemsize for a in params)

    c_i = compute_dtype.itemsize
    o_i = out_dtype.itemsize

    # ---- fused (weights VMEM-resident) vs per-layer (feature/K-tiled) path ----
    fused = (not force_per_layer) and (param_bytes <= vmem_cap // 2)

    if fused:
        max_h = max(pdims[1:-1]) if n_layer >= 2 else pdims[-1]

        def act_bytes(t):
            return (2 * t * pdims[0] * c_i + 2 * t * pdims[-1] * o_i
                    + t * max_h * 4 + t * max_h * c_i)

        if tile_n is None:
            tile_n = _round_up(min(512, _round_up(N, _SUBLANE)), _SUBLANE)
            while tile_n > _SUBLANE and param_bytes + act_bytes(tile_n) + (4 << 20) > vmem_cap:
                tile_n = _round_up(tile_n // 2, _SUBLANE)
        tile_n = _round_up(tile_n, _SUBLANE)
        n_pad = _round_up(N, tile_n)
        xp = jnp.pad(x, ((0, n_pad - N), (0, pdims[0] - in_dim))).astype(compute_dtype)

        try:
            out_pad = _fused_forward(xp, params, pdims, n_layer, compute_dtype, relu_dtype,
                                     out_dtype, tile_n, n_pad, vmem_cap,
                                     single_buffer_params=True)
        except Exception:
            # pipeline_mode=pl.Buffered(1) unsupported on this jax version: retry with default
            # (double) buffering of the constant-index weight blocks.
            out_pad = _fused_forward(xp, params, pdims, n_layer, compute_dtype, relu_dtype,
                                     out_dtype, tile_n, n_pad, vmem_cap,
                                     single_buffer_params=False)
    else:
        # Weights don't fit ~half of this generation's VMEM (e.g. big hidden_dim on v7x's
        # 64 MiB/TC): stream weight chunks per layer instead of keeping them all resident.
        if tile_n is None:
            tile_n = min(256, _round_up(N, _SUBLANE))
        tile_n = _round_up(tile_n, _SUBLANE)
        n_pad = _round_up(N, tile_n)
        h = jnp.pad(x, ((0, n_pad - N), (0, pdims[0] - in_dim))).astype(compute_dtype)
        for i in range(n_layer):
            last = i == n_layer - 1
            h = _linear_pallas(h, params[2 * i], params[2 * i + 1],
                               relu_input=(i > 0),
                               out_dtype=out_dtype if last else compute_dtype,
                               compute_dtype=compute_dtype, relu_dtype=relu_dtype,
                               tm=tile_n, vmem_cap=vmem_cap)
        out_pad = h

    return out_pad[:N, :out_dim]


def init_mlp_params(key, input_dim, hidden_dim, output_dim, n_layer):
    """Deterministic init mimicking nn.Linear.reset_parameters (uniform +-1/sqrt(fan_in)).

    Weights stored as [in, out] (transpose of PyTorch's [out, in]) so the kernel does h @ W.
    """
    dims = [input_dim] + [hidden_dim] * (n_layer - 1) + [output_dim]
    weights, biases = [], []
    for i in range(n_layer):
        fan_in, fan_out = dims[i], dims[i + 1]
        key, kw, kb = jax.random.split(key, 3)
        bound = 1.0 / jnp.sqrt(float(fan_in))
        w = jax.random.uniform(kw, (fan_in, fan_out), jnp.float32, -bound, bound)
        b = jax.random.uniform(kb, (1, fan_out), jnp.float32, -bound, bound)
        weights.append(w)
        biases.append(b)
    return weights, biases


def mlp_reference(x, weights, biases):
    """Plain-JAX f32 reference of the same forward pass (eval mode)."""
    h = x @ weights[0] + biases[0]
    for i in range(1, len(weights)):
        h = jnp.maximum(h, 0.0)
        h = h @ weights[i] + biases[i]
    return h


if __name__ == "__main__":
    N = 256
    input_dim = 32
    hidden_dim = 64
    output_dim = 16
    n_layer = 3
    dropout = 0.5    # unused at inference (training=False)

    key = jax.random.PRNGKey(0)
    key, kx = jax.random.split(key)
    x = jax.random.normal(kx, (N, input_dim), jnp.float32)
    weights, biases = init_mlp_params(key, input_dim, hidden_dim, output_dim, n_layer)

    ref = mlp_reference(x, weights, biases)

    # 1) f32 compute path (fused, explicit small tile -> grid=(2,)): padding/tiling is exact.
    out_f32 = jax.block_until_ready(
        mlp_forward(x, weights, biases, compute_dtype=jnp.float32, tile_n=128))
    assert out_f32.shape == (N, output_dim)
    assert jnp.allclose(out_f32, ref, atol=1e-5, rtol=1e-5), "f32 fused output mismatch"

    # 2) default bf16-MXU / f32-accumulation fused path (perf configuration, auto tile_n).
    out_bf16 = jax.block_until_ready(mlp_forward(x, weights, biases))
    assert out_bf16.shape == (N, output_dim)
    assert jnp.allclose(out_bf16, ref, atol=5e-2, rtol=5e-2), "bf16 fused output mismatch"

    # 3) bf16 output (halves padded-width writeback bytes).
    out_bf16_o = jax.block_until_ready(
        mlp_forward(x, weights, biases, out_dtype=jnp.bfloat16))
    assert out_bf16_o.dtype == jnp.bfloat16
    assert jnp.allclose(out_bf16_o.astype(jnp.float32), ref, atol=1e-1, rtol=1e-1), \
        "bf16-output mismatch"

    # 4) per-layer feature-tiled fallback (the path large-hidden_dim models take on v7x),
    #    exercised here in exact f32 to validate it end to end.
    out_fb = jax.block_until_ready(
        mlp_forward(x, weights, biases, compute_dtype=jnp.float32, force_per_layer=True))
    assert jnp.allclose(out_fb, ref, atol=1e-5, rtol=1e-5), "per-layer fallback mismatch"

    print("KERNEL_OK")
</pallas_src>

<mosaic_0001>
module attributes {stable_mosaic.version = 11 : i64} {
  func.func @_mlp_fused_kernel(%arg0: i32, %arg1: memref<128x128xf32, #tpu.memory_space<vmem>>, %arg2: memref<128x128xf32, #tpu.memory_space<vmem>>, %arg3: memref<1x128xf32, #tpu.memory_space<vmem>>, %arg4: memref<128x128xf32, #tpu.memory_space<vmem>>, %arg5: memref<1x128xf32, #tpu.memory_space<vmem>>, %arg6: memref<128x128xf32, #tpu.memory_space<vmem>>, %arg7: memref<1x128xf32, #tpu.memory_space<vmem>>, %arg8: memref<128x128xf32, #tpu.memory_space<vmem>>, %arg9: memref<128x128xf32, #tpu.memory_space<vmem>>) attributes {dimension_semantics = [#tpu.dimension_semantics<parallel>], iteration_bounds = array<i64: 2>, scalar_prefetch = 0 : i64, scratch_operands = 1 : i64, tpu.core_type = #tpu.core_type<tc>, window_params = [{transform_indices = @transform_0, window_bounds = array<i64: 128, 128>}, {pipeline_mode = #tpu.pipeline_mode<synchronous>, transform_indices = @transform_1, window_bounds = array<i64: 128, 128>}, {pipeline_mode = #tpu.pipeline_mode<synchronous>, transform_indices = @transform_2, window_bounds = array<i64: 1, 128>}, {pipeline_mode = #tpu.pipeline_mode<synchronous>, transform_indices = @transform_3, window_bounds = array<i64: 128, 128>}, {pipeline_mode = #tpu.pipeline_mode<synchronous>, transform_indices = @transform_4, window_bounds = array<i64: 1, 128>}, {pipeline_mode = #tpu.pipeline_mode<synchronous>, transform_indices = @transform_5, window_bounds = array<i64: 128, 128>}, {pipeline_mode = #tpu.pipeline_mode<synchronous>, transform_indices = @transform_6, window_bounds = array<i64: 1, 128>}, {transform_indices = @transform_7, window_bounds = array<i64: 128, 128>}]} {
    %c0 = arith.constant 0 : index
    %c0_0 = arith.constant 0 : index
    %0 = vector.load %arg1[%c0, %c0_0] : memref<128x128xf32, #tpu.memory_space<vmem>>, vector<128x128xf32>
    %c0_1 = arith.constant 0 : index
    %c0_2 = arith.constant 0 : index
    %1 = vector.load %arg2[%c0_1, %c0_2] : memref<128x128xf32, #tpu.memory_space<vmem>>, vector<128x128xf32>
    %cst = arith.constant dense<0.000000e+00> : vector<128x128xf32>
    %2 = tpu.matmul %0, %1, %cst {dimension_numbers = #tpu.dot_dimension_numbers<[1], [0], [0], [1], [0, 0, 1, 1], [], []>} : vector<128x128xf32>, vector<128x128xf32>, vector<128x128xf32> -> vector<128x128xf32>
    %c0_3 = arith.constant 0 : index
    %c0_4 = arith.constant 0 : index
    %3 = vector.load %arg3[%c0_3, %c0_4] : memref<1x128xf32, #tpu.memory_space<vmem>>, vector<1x128xf32>
    %4 = vector.broadcast %3 : vector<1x128xf32> to vector<128x128xf32>
    %5 = arith.addf %2, %4 : vector<128x128xf32>
    %c0_5 = arith.constant 0 : index
    %c0_6 = arith.constant 0 : index
    %6 = vector.load %arg9[%c0_5, %c0_6] : memref<128x128xf32, #tpu.memory_space<vmem>>, vector<128x128xf32>
    tpu.vector_store %arg9[%c0_5, %c0_6], %5 {strides = array<i32>} : memref<128x128xf32, #tpu.memory_space<vmem>>, vector<128x128xf32>,
    %c0_7 = arith.constant 0 : index
    %c0_8 = arith.constant 0 : index
    %7 = vector.load %arg9[%c0_7, %c0_8] : memref<128x128xf32, #tpu.memory_space<vmem>>, vector<128x128xf32>
    %cst_9 = arith.constant 0.000000e+00 : f32
    %8 = vector.broadcast %cst_9 : f32 to vector<128x128xf32>
    %9 = arith.maximumf %7, %8 : vector<128x128xf32>
    %c0_10 = arith.constant 0 : index
    %c0_11 = arith.constant 0 : index
    %10 = vector.load %arg4[%c0_10, %c0_11] : memref<128x128xf32, #tpu.memory_space<vmem>>, vector<128x128xf32>
    %cst_12 = arith.constant dense<0.000000e+00> : vector<128x128xf32>
    %11 = tpu.matmul %9, %10, %cst_12 {dimension_numbers = #tpu.dot_dimension_numbers<[1], [0], [0], [1], [0, 0, 1, 1], [], []>} : vector<128x128xf32>, vector<128x128xf32>, vector<128x128xf32> -> vector<128x128xf32>
    %c0_13 = arith.constant 0 : index
    %c0_14 = arith.constant 0 : index
    %12 = vector.load %arg5[%c0_13, %c0_14] : memref<1x128xf32, #tpu.memory_space<vmem>>, vector<1x128xf32>
    %13 = vector.broadcast %12 : vector<1x128xf32> to vector<128x128xf32>
    %14 = arith.addf %11, %13 : vector<128x128xf32>
    %c0_15 = arith.constant 0 : index
    %c0_16 = arith.constant 0 : index
    %15 = vector.load %arg9[%c0_15, %c0_16] : memref<128x128xf32, #tpu.memory_space<vmem>>, vector<128x128xf32>
    tpu.vector_store %arg9[%c0_15, %c0_16], %14 {strides = array<i32>} : memref<128x128xf32, #tpu.memory_space<vmem>>, vector<128x128xf32>,
    %c0_17 = arith.constant 0 : index
    %c0_18 = arith.constant 0 : index
    %16 = vector.load %arg9[%c0_17, %c0_18] : memref<128x128xf32, #tpu.memory_space<vmem>>, vector<128x128xf32>
    %cst_19 = arith.constant 0.000000e+00 : f32
    %17 = vector.broadcast %cst_19 : f32 to vector<128x128xf32>
    %18 = arith.maximumf %16, %17 : vector<128x128xf32>
    %c0_20 = arith.constant 0 : index
    %c0_21 = arith.constant 0 : index
    %19 = vector.load %arg6[%c0_20, %c0_21] : memref<128x128xf32, #tpu.memory_space<vmem>>, vector<128x128xf32>
    %cst_22 = arith.constant dense<0.000000e+00> : vector<128x128xf32>
    %20 = tpu.matmul %18, %19, %cst_22 {dimension_numbers = #tpu.dot_dimension_numbers<[1], [0], [0], [1], [0, 0, 1, 1], [], []>} : vector<128x128xf32>, vector<128x128xf32>, vector<128x128xf32> -> vector<128x128xf32>
    %c0_23 = arith.constant 0 : index
    %c0_24 = arith.constant 0 : index
    %21 = vector.load %arg7[%c0_23, %c0_24] : memref<1x128xf32, #tpu.memory_space<vmem>>, vector<1x128xf32>
    %22 = vector.broadcast %21 : vector<1x128xf32> to vector<128x128xf32>
    %23 = arith.addf %20, %22 : vector<128x128xf32>
    %c0_25 = arith.constant 0 : index
    %c0_26 = arith.constant 0 : index
    %24 = vector.load %arg8[%c0_25, %c0_26] : memref<128x128xf32, #tpu.memory_space<vmem>>, vector<128x128xf32>
    tpu.vector_store %arg8[%c0_25, %c0_26], %23 {strides = array<i32>} : memref<128x128xf32, #tpu.memory_space<vmem>>, vector<128x128xf32>,
    return
  }
  func.func @transform_0(%arg0: i32) -> (i32, i32) {
    %c0_i32 = arith.constant 0 : i32
    %c0_i32_0 = arith.constant 0 : i32
    return %arg0, %c0_i32 : i32, i32
  }
  func.func @transform_1(%arg0: i32) -> (i32, i32) {
    %c0_i32 = arith.constant 0 : i32
    %c0_i32_0 = arith.constant 0 : i32
    %c0_i32_1 = arith.constant 0 : i32
    return %c0_i32, %c0_i32_0 : i32, i32
  }
  func.func @transform_2(%arg0: i32) -> (i32, i32) {
    %c0_i32 = arith.constant 0 : i32
    %c0_i32_0 = arith.constant 0 : i32
    %c0_i32_1 = arith.constant 0 : i32
    return %c0_i32, %c0_i32_0 : i32, i32
  }
  func.func @transform_3(%arg0: i32) -> (i32, i32) {
    %c0_i32 = arith.constant 0 : i32
    %c0_i32_0 = arith.constant 0 : i32
    %c0_i32_1 = arith.constant 0 : i32
    return %c0_i32, %c0_i32_0 : i32, i32
  }
  func.func @transform_4(%arg0: i32) -> (i32, i32) {
    %c0_i32 = arith.constant 0 : i32
    %c0_i32_0 = arith.constant 0 : i32
    %c0_i32_1 = arith.constant 0 : i32
    return %c0_i32, %c0_i32_0 : i32, i32
  }
  func.func @transform_5(%arg0: i32) -> (i32, i32) {
    %c0_i32 = arith.constant 0 : i32
    %c0_i32_0 = arith.constant 0 : i32
    %c0_i32_1 = arith.constant 0 : i32
    return %c0_i32, %c0_i32_0 : i32, i32
  }
  func.func @transform_6(%arg0: i32) -> (i32, i32) {
    %c0_i32 = arith.constant 0 : i32
    %c0_i32_0 = arith.constant 0 : i32
    %c0_i32_1 = arith.constant 0 : i32
    return %c0_i32, %c0_i32_0 : i32, i32
  }
  func.func @transform_7(%arg0: i32) -> (i32, i32) {
    %c0_i32 = arith.constant 0 : i32
    %c0_i32_0 = arith.constant 0 : i32
    return %arg0, %c0_i32 : i32, i32
  }
}

module attributes {stable_mosaic.version = 11 : i64} {
  func.func @_mlp_fused_kernel(%arg0: i32, %arg1: memref<128x128xf32, #tpu.memory_space<vmem>>, %arg2: memref<128x128xf32, #tpu.memory_space<vmem>>, %arg3: memref<1x128xf32, #tpu.memory_space<vmem>>, %arg4: memref<128x128xf32, #tpu.memory_space<vmem>>, %arg5: memref<1x128xf32, #tpu.memory_space<vmem>>, %arg6: memref<128x128xf32, #tpu.memory_space<vmem>>, %arg7: memref<1x128xf32, #tpu.memory_space<vmem>>, %arg8: memref<128x128xf32, #tpu.memory_space<vmem>>, %arg9: memref<128x128xf32, #tpu.memory_space<vmem>>) attributes {dimension_semantics = [#tpu.dimension_semantics<parallel>], iteration_bounds = array<i64: 2>, scalar_prefetch = 0 : i64, scratch_operands = 1 : i64, tpu.core_type = #tpu.core_type<tc>, window_params = [{transform_indices = @transform_0, window_bounds = array<i64: 128, 128>}, {pipeline_mode = #tpu.pipeline_mode<synchronous>, transform_indices = @transform_1, window_bounds = array<i64: 128, 128>}, {pipeline_mode = #tpu.pipeline_mode<synchronous>, transform_indices = @transform_2, window_bounds = array<i64: 1, 128>}, {pipeline_mode = #tpu.pipeline_mode<synchronous>, transform_indices = @transform_3, window_bounds = array<i64: 128, 128>}, {pipeline_mode = #tpu.pipeline_mode<synchronous>, transform_indices = @transform_4, window_bounds = array<i64: 1, 128>}, {pipeline_mode = #tpu.pipeline_mode<synchronous>, transform_indices = @transform_5, window_bounds = array<i64: 128, 128>}, {pipeline_mode = #tpu.pipeline_mode<synchronous>, transform_indices = @transform_6, window_bounds = array<i64: 1, 128>}, {transform_indices = @transform_7, window_bounds = array<i64: 128, 128>}]} {
    %c0 = arith.constant 0 : index
    %c0_0 = arith.constant 0 : index
    %0 = vector.load %arg1[%c0, %c0_0] : memref<128x128xf32, #tpu.memory_space<vmem>>, vector<128x128xf32>
    %c0_1 = arith.constant 0 : index
    %c0_2 = arith.constant 0 : index
    %1 = vector.load %arg2[%c0_1, %c0_2] : memref<128x128xf32, #tpu.memory_space<vmem>>, vector<128x128xf32>
    %cst = arith.constant dense<0.000000e+00> : vector<128x128xf32>
    %2 = tpu.matmul %0, %1, %cst {dimension_numbers = #tpu.dot_dimension_numbers<[1], [0], [0], [1], [0, 0, 1, 1], [], []>} : vector<128x128xf32>, vector<128x128xf32>, vector<128x128xf32> -> vector<128x128xf32>
    %c0_3 = arith.constant 0 : index
    %c0_4 = arith.constant 0 : index
    %3 = vector.load %arg3[%c0_3, %c0_4] : memref<1x128xf32, #tpu.memory_space<vmem>>, vector<1x128xf32>
    %4 = vector.broadcast %3 : vector<1x128xf32> to vector<128x128xf32>
    %5 = arith.addf %2, %4 : vector<128x128xf32>
    %c0_5 = arith.constant 0 : index
    %c0_6 = arith.constant 0 : index
    %6 = vector.load %arg9[%c0_5, %c0_6] : memref<128x128xf32, #tpu.memory_space<vmem>>, vector<128x128xf32>
    tpu.vector_store %arg9[%c0_5, %c0_6], %5 {strides = array<i32>} : memref<128x128xf32, #tpu.memory_space<vmem>>, vector<128x128xf32>,
    %c0_7 = arith.constant 0 : index
    %c0_8 = arith.constant 0 : index
    %7 = vector.load %arg9[%c0_7, %c0_8] : memref<128x128xf32, #tpu.memory_space<vmem>>, vector<128x128xf32>
    %cst_9 = arith.constant 0.000000e+00 : f32
    %8 = vector.broadcast %cst_9 : f32 to vector<128x128xf32>
    %9 = arith.maximumf %7, %8 : vector<128x128xf32>
    %c0_10 = arith.constant 0 : index
    %c0_11 = arith.constant 0 : index
    %10 = vector.load %arg4[%c0_10, %c0_11] : memref<128x128xf32, #tpu.memory_space<vmem>>, vector<128x128xf32>
    %cst_12 = arith.constant dense<0.000000e+00> : vector<128x128xf32>
    %11 = tpu.matmul %9, %10, %cst_12 {dimension_numbers = #tpu.dot_dimension_numbers<[1], [0], [0], [1], [0, 0, 1, 1], [], []>} : vector<128x128xf32>, vector<128x128xf32>, vector<128x128xf32> -> vector<128x128xf32>
    %c0_13 = arith.constant 0 : index
    %c0_14 = arith.constant 0 : index
    %12 = vector.load %arg5[%c0_13, %c0_14] : memref<1x128xf32, #tpu.memory_space<vmem>>, vector<1x128xf32>
    %13 = vector.broadcast %12 : vector<1x128xf32> to vector<128x128xf32>
    %14 = arith.addf %11, %13 : vector<128x128xf32>
    %c0_15 = arith.constant 0 : index
    %c0_16 = arith.constant 0 : index
    %15 = vector.load %arg9[%c0_15, %c0_16] : memref<128x128xf32, #tpu.memory_space<vmem>>, vector<128x128xf32>
    tpu.vector_store %arg9[%c0_15, %c0_16], %14 {strides = array<i32>} : memref<128x128xf32, #tpu.memory_space<vmem>>, vector<128x128xf32>,
    %c0_17 = arith.constant 0 : index
    %c0_18 = arith.constant 0 : index
    %16 = vector.load %arg9[%c0_17, %c0_18] : memref<128x128xf32, #tpu.memory_space<vmem>>, vector<128x128xf32>
    %cst_19 = arith.constant 0.000000e+00 : f32
    %17 = vector.broadcast %cst_19 : f32 to vector<128x128xf32>
    %18 = arith.maximumf %16, %17 : vector<128x128xf32>
    %c0_20 = arith.constant 0 : index
    %c0_21 = arith.constant 0 : index
    %19 = vector.load %arg6[%c0_20, %c0_21] : memref<128x128xf32, #tpu.memory_space<vmem>>, vector<128x128xf32>
    %cst_22 = arith.constant dense<0.000000e+00> : vector<128x128xf32>
    %20 = tpu.matmul %18, %19, %cst_22 {dimension_numbers = #tpu.dot_dimension_numbers<[1], [0], [0], [1], [0, 0, 1, 1], [], []>} : vector<128x128xf32>, vector<128x128xf32>, vector<128x128xf32> -> vector<128x128xf32>
    %c0_23 = arith.constant 0 : index
    %c0_24 = arith.constant 0 : index
    %21 = vector.load %arg7[%c0_23, %c0_24] : memref<1x128xf32, #tpu.memory_space<vmem>>, vector<1x128xf32>
    %22 = vector.broadcast %21 : vector<1x128xf32> to vector<128x128xf32>
    %23 = arith.addf %20, %22 : vector<128x128xf32>
    %c0_25 = arith.constant 0 : index
    %c0_26 = arith.constant 0 : index
    %24 = vector.load %arg8[%c0_25, %c0_26] : memref<128x128xf32, #tpu.memory_space<vmem>>, vector<128x128xf32>
    tpu.vector_store %arg8[%c0_25, %c0_26], %23 {strides = array<i32>} : memref<128x128xf32, #tpu.memory_space<vmem>>, vector<128x128xf32>,
    return
  }
  func.func @transform_0(%arg0: i32) -> (i32, i32) {
    %c0_i32 = arith.constant 0 : i32
    %c0_i32_0 = arith.constant 0 : i32
    return %arg0, %c0_i32 : i32, i32
  }
  func.func @transform_1(%arg0: i32) -> (i32, i32) {
    %c0_i32 = arith.constant 0 : i32
    %c0_i32_0 = arith.constant 0 : i32
    %c0_i32_1 = arith.constant 0 : i32
    return %c0_i32, %c0_i32_0 : i32, i32
  }
  func.func @transform_2(%arg0: i32) -> (i32, i32) {
    %c0_i32 = arith.constant 0 : i32
    %c0_i32_0 = arith.constant 0 : i32
    %c0_i32_1 = arith.constant 0 : i32
    return %c0_i32, %c0_i32_0 : i32, i32
  }
  func.func @transform_3(%arg0: i32) -> (i32, i32) {
    %c0_i32 = arith.constant 0 : i32
    %c0_i32_0 = arith.constant 0 : i32
    %c0_i32_1 = arith.constant 0 : i32
    return %c0_i32, %c0_i32_0 : i32, i32
  }
  func.func @transform_4(%arg0: i32) -> (i32, i32) {
    %c0_i32 = arith.constant 0 : i32
    %c0_i32_0 = arith.constant 0 : i32
    %c0_i32_1 = arith.constant 0 : i32
    return %c0_i32, %c0_i32_0 : i32, i32
  }
  func.func @transform_5(%arg0: i32) -> (i32, i32) {
    %c0_i32 = arith.constant 0 : i32
    %c0_i32_0 = arith.constant 0 : i32
    %c0_i32_1 = arith.constant 0 : i32
    return %c0_i32, %c0_i32_0 : i32, i32
  }
  func.func @transform_6(%arg0: i32) -> (i32, i32) {
    %c0_i32 = arith.constant 0 : i32
    %c0_i32_0 = arith.constant 0 : i32
    %c0_i32_1 = arith.constant 0 : i32
    return %c0_i32, %c0_i32_0 : i32, i32
  }
  func.func @transform_7(%arg0: i32) -> (i32, i32) {
    %c0_i32 = arith.constant 0 : i32
    %c0_i32_0 = arith.constant 0 : i32
    return %arg0, %c0_i32 : i32, i32
  }
}

</mosaic_0001>

<bundles_post_ra>
// kernel: tpu_custom_call.1
= control target key start
LH: loop header
LB: loop body
LE: loop exit
PB: predicated region body
PF: predicated region fallthrough
CT: control target
= control target key end

     0   :  { %12 = vsyncpa [#allocation4], 0  ;;  %s2175_s0 = inlined_call_operand.hbm [shape: f32[256,128], index: 0, kind: input, shape index: {}]   ;;  %s2176_s1 = inlined_call_operand.hbm [shape: f32[128,128], index: 1, kind: input, shape index: {}]   ;;  %s2177_s2 = inlined_call_operand.vmem [shape: f32[1,128], index: 2, kind: input, shape index: {}]   ;;  %s2178_s3 = inlined_call_operand.hbm [shape: f32[128,128], index: 3, kind: input, shape index: {}]   ;;  %s2179_s4 = inlined_call_operand.vmem [shape: f32[1,128], index: 4, kind: input, shape index: {}]   ;;  %s2180_s5 = inlined_call_operand.hbm [shape: f32[128,128], index: 5, kind: input, shape index: {}]   ;;  %s2181_s6 = inlined_call_operand.vmem [shape: f32[1,128], index: 6, kind: input, shape index: {}]   ;;  %s2182_s7 = inlined_call_operand.hbm [shape: f32[256,128], index: 7, kind: output, shape index: {}]  }
   0x1   :  { %14 = vsyncpa [#allocation4 + $0x1], 0 }
   0x2   :  { %15 = vsyncpa [#allocation7], 0 }
   0x3   :  { %16 = vsyncpa [#allocation10], 0 }
   0x4   :  { %17 = vsyncpa [#allocation5], 0 }
   0x5   :  { %19 = vsyncpa [#allocation5 + $0x1], 0  ;;  %s1812_s24 = smov 0   ;;  %s1814_s25 = smov 0  }
   0x6   :  { %s1816_s26 = smov 0   ;;  %s1818_s27 = smov 0  }
   0x7 LB: > { %s1833_s28 = sadd.s32 4294967295, %s1761_s27   ;;  %s1091_s29 = sadd.s32 4294967294, %s1761_s27   ;;  %s1761_s27 = sphi %s1818_s27, %s2208_s27   ;;  %s1757_s26 = sphi %s1816_s26, %s2207_s26   ;;  %s1753_s25 = sphi %s1814_s25, %s2206_s25   ;;  %s1749_s24 = sphi %s1812_s24, %s2205_s24  }
   0x8   : > { %p45_p0 = scmp.ne.s32.totalorder %s1753_s25, %s1749_s24  ;;  %p2183_p1 = scmp.eq.s32.totalorder %s1833_s28, 0 }
   0x9   : > { %p201_p3 = scmp.eq.s32.totalorder %s1091_s29, 1  ;;  %p1092_p5 = scmp.ge.s32.totalorder %s1761_s27, 1 }
   0xa   : > { %p1842_p4 = por %p2183_p1, %p45_p0  ;;  %p208_p7 = scmp.lt.s32.totalorder %s1761_s27, 3 }
   0xb   : > { %p1847_p6 = por %p201_p3, %p45_p0  ;;  %s1763_s10 = smov [#allocation6]  }
   0xc   : > { %s2187_s30 = scalar_select %p1842_p4, 1, 0 }
   0xd   : > { %s2188_s8 = scalar_select %p1847_p6, 1, 0 }
   0xe   : > { %p1852_p8 = pnand %p1092_p5, %p208_p7  ;;  %s220_s11 = sshll.u32 %s1763_s10, 4  ;;  %s1856_s11 = int_to_ptr.vmem [resolvable:$true] %s220_s11 }
   0xf   : > { %2189 = sst [smem:[#allocation16_spill]] %s2188_s8  ;;  %s1764_s13 = smov [#allocation8]  }
  0x10   : > { %s2190_s9 = scalar_select %p1852_p8, 1, 0 }
  0x11   : > { %p1508_p9 = pneg %p1852_p8  ;;  %s236_s14 = sshll.u32 %s1764_s13, 4  ;;  %s1867_s14 = int_to_ptr.vmem [resolvable:$true] %s236_s14 }
  0x12   : > { %s1765_s15 = smov [#allocation9]   ;;  %s1573_s19 = scalar_lea.hbm %s2176_s1, 2048 }
  0x13   : > { %p1863_p11 = pnand %p1508_p9, %p2183_p1  ;;  %s1869_s16 = sshll.u32 %s1765_s15, 4  ;;  %s253_s16 = int_to_ptr.vmem [resolvable:$true] %s1869_s16 }
  0x14   : > { %p1574_p12 = scmp.ne.s32.totalorder %s2176_s1, %s1573_s19  ;;  %p1580_p5 = scmp.lt.u32.totalorder %s1573_s19, %s2176_s1 }
  0x15   : > { %p1879_p13 = pneg %p1863_p11 }
  0x17   : > { %p1576_p0 = pnand %p1879_p13, %p1574_p12 }
  0x19   : > { %p1577_p3 = pneg %p1576_p0 }
  0x1b   : > { %p1582_p7 = pnand %p1580_p5, %p1577_p3 }
  0x1d   : > { %1585 = shalt.err (!%p1582_p7)
}
  0x1e   : > { %s1586_s10 = scalar_lea.vmem %s1856_s11, 2048  ;;  %p1594_p2 = scmp.lt.s32.totalorder %s1856_s11, %s1856_s11 }
  0x1f   : > { %p1587_p9 = scmp.ne.s32.totalorder %s1856_s11, %s1586_s10  ;;  %p1595_p6 = scmp.lt.s32.totalorder %s1586_s10, %s1586_s10 }
  0x21   : > { %p1589_p10 = pnand %p1587_p9, %p1879_p13  ;;  %p1596_p12 = por %p1595_p6, %p1594_p2 }
  0x23   : > { %p1590_p1 = pneg %p1589_p10 }
  0x25   : > { %p1597_p0 = pnand %p1596_p12, %p1590_p1 }
  0x27   : > { %1600 = shalt.err (!%p1597_p0)
}
  0x28   : > { %s1766_s13 = smov 128   ;;  %s1767_s15 = smov 8  }
  0x29   : > { %1511 = dma.hbm_to_vmem [thread:$0]  (!%p1863_p11), %s2176_s1, 2048, %s1856_s11, [#allocation7], %s1766_s13, %s1766_s13, %s1767_s15  }
  0x2a   : > { %s1601_s21 = scalar_lea.hbm %s2178_s3, 2048 }
  0x2b   : > { %p1602_p1 = scmp.ne.s32.totalorder %s2178_s3, %s1601_s21  ;;  %p1608_p10 = scmp.lt.u32.totalorder %s1601_s21, %s2178_s3 }
  0x2d   : > { %p1604_p2 = pnand %p1602_p1, %p1879_p13 }
  0x2f   : > { %p1605_p6 = pneg %p1604_p2 }
  0x31   : > { %p1610_p3 = pnand %p1608_p10, %p1605_p6 }
  0x33   : > { %1613 = shalt.err (!%p1610_p3)
}
  0x34   : > { %s1614_s11 = scalar_lea.vmem %s1867_s14, 2048  ;;  %p1622_p12 = scmp.lt.s32.totalorder %s1867_s14, %s1867_s14 }
  0x35   : > { %p1615_p5 = scmp.ne.s32.totalorder %s1867_s14, %s1614_s11  ;;  %p1623_p0 = scmp.lt.s32.totalorder %s1614_s11, %s1614_s11 }
  0x37   : > { %p1617_p7 = pnand %p1615_p5, %p1879_p13  ;;  %p1624_p1 = por %p1623_p0, %p1622_p12 }
  0x39   : > { %p1618_p9 = pneg %p1617_p7 }
  0x3b   : > { %p1625_p2 = pnand %p1624_p1, %p1618_p9 }
  0x3d   : > { %1628 = shalt.err (!%p1625_p2)
}
  0x3e   : > { %1514 = dma.hbm_to_vmem [thread:$0]  (!%p1863_p11), %s2178_s3, 2048, %s1867_s14, [#allocation7], %s1766_s13, %s1766_s13, %s1767_s15  }
  0x3f   : > { %s1629_s20 = scalar_lea.hbm %s2180_s5, 2048 }
  0x40   : > { %p1630_p6 = scmp.ne.s32.totalorder %s2180_s5, %s1629_s20  ;;  %p1636_p5 = scmp.lt.u32.totalorder %s1629_s20, %s2180_s5 }
  0x42   : > { %p1632_p10 = pnand %p1630_p6, %p1879_p13 }
  0x44   : > { %p1633_p3 = pneg %p1632_p10 }
  0x46   : > { %p1638_p7 = pnand %p1636_p5, %p1633_p3 }
  0x48   : > { %1641 = shalt.err (!%p1638_p7)
}
  0x49   : > { %s1642_s11 = scalar_lea.vmem %s253_s16, 2048  ;;  %p1650_p1 = scmp.lt.s32.totalorder %s253_s16, %s253_s16 }
  0x4a   : > { %p1643_p9 = scmp.ne.s32.totalorder %s253_s16, %s1642_s11  ;;  %p1651_p2 = scmp.lt.s32.totalorder %s1642_s11, %s1642_s11 }
  0x4c   : > { %p1645_p12 = pnand %p1643_p9, %p1879_p13  ;;  %p1652_p4 = por %p1651_p2, %p1650_p1 }
  0x4e   : > { %p1646_p0 = pneg %p1645_p12 }
  0x50   : > { %p1653_p8 = pnand %p1652_p4, %p1646_p0 }
  0x52   : > { %1656 = shalt.err (!%p1653_p8)
}
  0x53   : > { %1517 = dma.hbm_to_vmem [thread:$0]  (!%p1863_p11), %s2180_s5, 2048, %s253_s16, [#allocation10], %s1766_s13, %s1766_s13, %s1767_s15  }
  0x54   : > { %s1952_s22 = sadd.s32 1, %s1761_s27   ;;  %s32_s17 = sadd.s32 1, %s1757_s26 }
  0x55   : > { %s29_s12 = ssub.s32 %s1761_s27, %s1952_s22  ;;  %p39_p8 = scmp.ne.s32.totalorder %s1757_s26, %s1753_s25 }
  0x56   : > { %p30_p4 = scmp.eq.s32.totalorder %s29_s12, 0  ;;  %p40_p13 = scmp.eq.s32.totalorder %s1761_s27, 0 }
  0x57   : > { %p1529_p6 = scmp.lt.s32.totalorder %s1761_s27, 2  ;;  %p2193_p3 = scmp.eq.s32.totalorder %s1833_s28, 1 }
  0x58   : > { %s1962_s18 = scalar_select %p30_p4, %s1757_s26, %s32_s17  }
  0x59   : > { %p41_p10 = por %p40_p13, %p39_p8  ;;  %p1966_p5 = por %p2193_p3, %p39_p8 }
  0x5a   : > { %s269_s20 = sand.u32 1, %s1757_s26   ;;  %s1114_s21 = sshll.u32 %s1761_s27, 11 }
  0x5b   : > { %s1097_s16 = sshll.u32 %s269_s20, 7  ;;  %s1975_s10 = scalar_lea.hbm %s2175_s0, %s1114_s21 }
  0x5c   : > { %s273_s11 = scalar_lea.vmem [#allocation3], %s1097_s16  ;;  %p1977_p11 = pnand %p1529_p6, %p41_p10 }
  0x5d   : > { %s280_s14 = sshll.u32 %s273_s11, 4  ;;  %s1983_s12 = scalar_lea.sflag [#allocation4], %s269_s20  ;;  %s1981_s14 = int_to_ptr.vmem [resolvable:$true] %s280_s14 }
  0x5e   : > { %s1657_s17 = scalar_lea.hbm %s1975_s10, 2048  ;;  %p1659_p9 = pneg %p1977_p11 }
  0x5f   : > { %p1658_p7 = scmp.ne.s32.totalorder %s1975_s10, %s1657_s17  ;;  %s1662_s23 = scalar_lea.hbm %s2175_s0, 4096 }
  0x60   : > { %p1663_p1 = scmp.lt.u32.totalorder %s1975_s10, %s2175_s0  ;;  %p1664_p2 = scmp.lt.u32.totalorder %s1662_s23, %s1657_s17 }
  0x61   : > { %p1660_p12 = pnand %p1659_p9, %p1658_p7  ;;  %p1666_p8 = scmp.lt.u32.totalorder %s1657_s17, %s1975_s10 }
  0x62   : > { %p1665_p4 = por %p1664_p2, %p1663_p1 }
  0x63   : > { %p1661_p0 = pneg %p1660_p12 }
  0x64   : > { %p1667_p13 = por %p1666_p8, %p1665_p4 }
  0x66   : > { %p1668_p6 = pnand %p1667_p13, %p1661_p0 }
  0x68   : > { %1671 = shalt.err (!%p1668_p6)
}
  0x69   : > { %s1672_s20 = scalar_lea.vmem %s1981_s14, 2048  ;;  %s1768_s21 = smov [#allocation3]  }
  0x6a   : > { %p1673_p10 = scmp.ne.s32.totalorder %s1981_s14, %s1672_s20  ;;  %s1677_s16 = sshll.u32 %s1768_s21, 4  ;;  %s1678_s16 = int_to_ptr.vmem [resolvable:$false] %s1677_s16 }
  0x6b   : > { %s1679_s29 = scalar_lea.vmem %s1678_s16, 4096  ;;  %p1680_p12 = scmp.lt.s32.totalorder %s1981_s14, %s1678_s16 }
  0x6c   : > { %p1675_p3 = pnand %p1673_p10, %p1659_p9  ;;  %p1681_p1 = scmp.lt.s32.totalorder %s1679_s29, %s1672_s20 }
  0x6e   : > { %p1676_p7 = pneg %p1675_p3  ;;  %p1682_p2 = por %p1681_p1, %p1680_p12 }
  0x70   : > { %p1683_p4 = pnand %p1682_p2, %p1676_p7 }
  0x72   : > { %1686 = shalt.err (!%p1683_p4)
}
  0x73   : > { %1521 = dma.hbm_to_vmem [thread:$0]  (!%p1977_p11), %s1975_s10, 2048, %s1981_s14, %s1983_s12, %s1766_s13, %s1766_s13, %s1767_s15  }
  0x74   : > { %p2196_p9 = scmp.ne.s32.totalorder %s2190_s9, 0 }
  0x75   : > { %s2017_s17 = sand.u32 (!%p2196_p9), 1, %s1753_s25   ;;  %p2197_p0 = scmp.ne.s32.totalorder (!%p2196_p9), %s2187_s30, 0 }
  0x76   : > { %292 = sbr.rel (%p2196_p9) target bundleno = 862 (0x35e), region = 48  ;;  %s1101_s23 = sshll.u32 (!%p2196_p9), %s2017_s17, 7 }
  0x77   : > { %s295_s11 = scalar_lea.sflag (!%p2196_p9), [#allocation4], %s2017_s17  ;;  %s2023_s8 = scalar_lea.vmem (!%p2196_p9), [#allocation3], %s1101_s23 }
  0x7d   : > { %1732 = dma.done.wait (%p2197_p0), %s295_s11, 2048  }
  0x7e   : > { %1734 = vsyncadd (%p2197_p0), %s295_s11, 4294965248  ;;  %p2198_p11 = scmp.eq.s32.totalorder %s1833_s28, 0 }
  0x80   : > { %1736 = dma.done.wait (%p2198_p11), [#allocation7], 4096   ;;  %p2199_p8 = pmov %p2198_p11 }
  0x82   : > { %1738 = vsyncadd (%p2199_p8), [#allocation7], 4294963200  ;;  %p2200_p13 = pmov %p2199_p8 }
  0x83   : > { %p2201_p6 = pmov %p2199_p8 }
  0x84   : > { %1740 = dma.done.wait (%p2200_p13), [#allocation10], 2048  }
  0x85   : > { %1742 = vsyncadd (%p2201_p6), [#allocation10], 4294965248  ;;  %v359_v0 = vld [vmem:[#allocation6] sm:$0xff]  ;;  %v360_v1 = vld [vmem:[#allocation6 + $0x8] sm:$0xff]  ;;  %s2106_s12 = scalar_lea.vmem [#allocation11], %s1101_s23  ;;  %s1115_s20 = sshll.u32 %s1833_s28, 11 }
  0x86   : > { %v361_v2 = vld [vmem:[#allocation6 + $0x10] sm:$0xff]  ;;  %v1380_v3 = vpack.c.bf16 %v360_v1, %v359_v0  ;;  %v362_v4 = vld [vmem:[#allocation6 + $0x18] sm:$0xff]  ;;  %v363_v6 = vld [vmem:[#allocation6 + $0x20] sm:$0xff]  ;;  %s989_s21 = sshll.u32 %s2106_s12, 4  ;;  %s2127_s23 = scalar_lea.hbm %s2182_s7, %s1115_s20  ;;  %s2129_s21 = int_to_ptr.vmem [resolvable:$true] %s989_s21 }
  0x87   : > { %v1384_v5 = vpack.c.bf16 %v362_v4, %v361_v2  ;;  %v364_v7 = vld [vmem:[#allocation6 + $0x28] sm:$0xff]  ;;  %v343_v9 = vld [vmem:[%s2023_s8] sm:$0xff]  ;;  %v365_v10 = vld [vmem:[#allocation6 + $0x30] sm:$0xff]  ;;  %s976_s28 = scalar_lea.sflag [#allocation5], %s2017_s17  ;;  %s1687_s11 = scalar_lea.vmem %s2129_s21, 2048 }
  0x88   : > { %1381 = vmatprep.subr.bf16.mxu0 %v1380_v3  ;;  %v1388_v8 = vpack.c.bf16 %v364_v7, %v363_v6  ;;  %v366_v11 = vld [vmem:[#allocation6 + $0x38] sm:$0xff]  ;;  %1244 = vmatprep.mubr.f32.mxu0 %v343_v9  ;;  %v367_v13 = vld [vmem:[#allocation6 + $0x40] sm:$0xff]  ;;  %v368_v14 = vld [vmem:[#allocation6 + $0x48] sm:$0xff]  ;;  %p1688_p10 = scmp.ne.s32.totalorder %s2129_s21, %s1687_s11 }
  0x89   : > { %1383 = vmatpush3.bf16.msra.mxu0 %v1380_v3  ;;  %v1392_v12 = vpack.c.bf16 %v366_v11, %v365_v10  ;;  %v575_v15 = vld [vmem:[#allocation8] sm:$0xff]  ;;  %v576_v16 = vld [vmem:[#allocation8 + $0x8] sm:$0xff]  ;;  %v577_v17 = vld [vmem:[#allocation8 + $0x10] sm:$0xff]  ;;  %v1396_v21 = vpack.c.bf16 %v368_v14, %v367_v13 }
  0x8a   : > { %1385 = vmatprep.subr.bf16.mxu0 %v1384_v5  ;;  %v578_v18 = vld [vmem:[#allocation8 + $0x18] sm:$0xff]  ;;  %v1412_v19 = vpack.c.bf16 %v576_v16, %v575_v15  ;;  %v579_v22 = vld [vmem:[#allocation8 + $0x20] sm:$0xff]  ;;  %v580_v23 = vld [vmem:[#allocation8 + $0x28] sm:$0xff]  ;;  %p1689_p3 = pnand %p1688_p10, %p1966_p5 }
  0x8b   : > { %v1416_v20 = vpack.c.bf16 %v578_v18, %v577_v17  ;;  %v369_v24 = vld [vmem:[#allocation6 + $0x50] sm:$0xff]  ;;  %v370_v25 = vld [vmem:[#allocation6 + $0x58] sm:$0xff]  ;;  %v1420_v26 = vpack.c.bf16 %v580_v23, %v579_v22  ;;  %v371_v30 = vld [vmem:[#allocation6 + $0x60] sm:$0xff] }
  0x8c   : > { %1413 = vmatprep.subr.bf16.mxu1 %v1412_v19  ;;  %v1400_v27 = vpack.c.bf16 %v370_v25, %v369_v24  ;;  %v581_v28 = vld [vmem:[#allocation8 + $0x30] sm:$0xff]  ;;  %v582_v29 = vld [vmem:[#allocation8 + $0x38] sm:$0xff]  ;;  %v372_v31 = vld [vmem:[#allocation6 + $0x68] sm:$0xff]  ;;  %p1690_p7 = pneg %p1689_p3 }
  0x8d   : > { %1387 = vmatpush3.bf16.msra.mxu0 %v1384_v5  ;;  %1415 = vmatpush3.bf16.msra.mxu1 %v1412_v19  ;;  %v1424_v32 = vpack.c.bf16 %v582_v29, %v581_v28  ;;  %v1404_v33 = vpack.c.bf16 %v372_v31, %v371_v30  ;;  %v583_v34 = vld [vmem:[#allocation8 + $0x40] sm:$0xff]  ;;  %v584_v35 = vld [vmem:[#allocation8 + $0x48] sm:$0xff]  ;;  %v373_v36 = vld [vmem:[#allocation6 + $0x70] sm:$0xff] }
  0x8e   : > { %1389 = vmatprep.subr.bf16.mxu0 %v1388_v8  ;;  %1417 = vmatprep.subr.bf16.mxu1 %v1416_v20  ;;  %v374_v37 = vld [vmem:[#allocation6 + $0x78] sm:$0xff]  ;;  %v1428_v38 = vpack.c.bf16 %v584_v35, %v583_v34  ;;  %v585_v40 = vld [vmem:[#allocation8 + $0x50] sm:$0xff]  ;;  %v587_v43 = vld [vmem:[#allocation8 + $0x60] sm:$0xff] }
  0x8f   : > { %v1408_v39 = vpack.c.bf16 %v374_v37, %v373_v36  ;;  %v586_v41 = vld [vmem:[#allocation8 + $0x58] sm:$0xff]  ;;  %v588_v44 = vld [vmem:[#allocation8 + $0x68] sm:$0xff]  ;;  %v345_v47 = vld [vmem:[%s2023_s8 + $0x10] sm:$0xff] }
  0x90   : > { %v1432_v42 = vpack.c.bf16 %v586_v41, %v585_v40  ;;  %v344_v45 = vld [vmem:[%s2023_s8 + $0x8] sm:$0xff]  ;;  %v1436_v46 = vpack.c.bf16 %v588_v44, %v587_v43  ;;  %v346_v48 = vld [vmem:[%s2023_s8 + $0x18] sm:$0xff]  ;;  %v347_v49 = vld [vmem:[%s2023_s8 + $0x20] sm:$0xff] }
  0x91   : > { %1391 = vmatpush3.bf16.msra.mxu0 %v1388_v8  ;;  %1419 = vmatpush3.bf16.msra.mxu1 %v1416_v20  ;;  %v348_v50 = vld [vmem:[%s2023_s8 + $0x28] sm:$0xff]  ;;  %v349_v51 = vld [vmem:[%s2023_s8 + $0x30] sm:$0xff]  ;;  %v350_v52 = vld [vmem:[%s2023_s8 + $0x38] sm:$0xff] }
  0x92   : > { %1393 = vmatprep.subr.bf16.mxu0 %v1392_v12  ;;  %1421 = vmatprep.subr.bf16.mxu1 %v1420_v26  ;;  %v351_v53 = vld [vmem:[%s2023_s8 + $0x40] sm:$0xff]  ;;  %v352_v54 = vld [vmem:[%s2023_s8 + $0x48] sm:$0xff]  ;;  %v353_v55 = vld [vmem:[%s2023_s8 + $0x50] sm:$0xff] }
  0x93   : > { %v354_v56 = vld [vmem:[%s2023_s8 + $0x58] sm:$0xff]  ;;  %v355_v57 = vld [vmem:[%s2023_s8 + $0x60] sm:$0xff]  ;;  %v356_v58 = vld [vmem:[%s2023_s8 + $0x68] sm:$0xff] }
  0x94   : > { %v357_v59 = vld [vmem:[%s2023_s8 + $0x70] sm:$0xff]  ;;  %v358_v60 = vld [vmem:[%s2023_s8 + $0x78] sm:$0xff]  ;;  %v791_v0 = vld [vmem:[#allocation9] sm:$0xff]  ;;  %s1769_s8 = smov [#allocation11]  }
  0x95   : > { %1395 = vmatpush3.bf16.msra.mxu0 %v1392_v12  ;;  %1423 = vmatpush3.bf16.msra.mxu1 %v1420_v26  ;;  %v589_v61 = vld [vmem:[#allocation8 + $0x70] sm:$0xff]  ;;  %v590_v62 = vld [vmem:[#allocation8 + $0x78] sm:$0xff]  ;;  %v792_v1 = vld [vmem:[#allocation9 + $0x8] sm:$0xff]  ;;  %s1691_s30 = sshll.u32 %s1769_s8, 4  ;;  %s1692_s30 = int_to_ptr.vmem [resolvable:$false] %s1691_s30 }
  0x96   : > { %1397 = vmatprep.subr.bf16.mxu0 %v1396_v21  ;;  %1425 = vmatprep.subr.bf16.mxu1 %v1424_v32  ;;  %v1440_v63 = vpack.c.bf16 %v590_v62, %v589_v61  ;;  %v793_v2 = vld [vmem:[#allocation9 + $0x10] sm:$0xff]  ;;  %v1444_v3 = vpack.c.bf16 %v792_v1, %v791_v0  ;;  %v794_v4 = vld [vmem:[#allocation9 + $0x18] sm:$0xff]  ;;  %v795_v6 = vld [vmem:[#allocation9 + $0x20] sm:$0xff]  ;;  %s1693_s9 = scalar_lea.vmem %s1692_s30, 4096  ;;  %p1694_p12 = scmp.lt.s32.totalorder %s2129_s21, %s1692_s30 }
  0x97   : > { %v1448_v5 = vpack.c.bf16 %v794_v4, %v793_v2  ;;  %v796_v7 = vld [vmem:[#allocation9 + $0x28] sm:$0xff]  ;;  %v797_v9 = vld [vmem:[#allocation9 + $0x30] sm:$0xff]  ;;  %v798_v10 = vld [vmem:[#allocation9 + $0x38] sm:$0xff]  ;;  %p1695_p1 = scmp.lt.s32.totalorder %s1693_s9, %s1687_s11 }
  0x98   : > { %v1452_v8 = vpack.c.bf16 %v796_v7, %v795_v6  ;;  %v2053_v11 = vpack.c.bf16 %v798_v10, %v797_v9  ;;  %v799_v12 = vld [vmem:[#allocation9 + $0x40] sm:$0xff]  ;;  %v800_v13 = vld [vmem:[#allocation9 + $0x48] sm:$0xff]  ;;  %v801_v15 = vld [vmem:[#allocation9 + $0x50] sm:$0xff] }
  0x99   : > { %1399 = vmatpush3.bf16.msra.mxu0 %v1396_v21  ;;  %1427 = vmatpush3.bf16.msra.mxu1 %v1424_v32  ;;  %v2056_v14 = vpack.c.bf16 %v800_v13, %v799_v12  ;;  %v802_v16 = vld [vmem:[#allocation9 + $0x58] sm:$0xff]  ;;  %v803_v18 = vld [vmem:[#allocation9 + $0x60] sm:$0xff]  ;;  %v804_v19 = vld [vmem:[#allocation9 + $0x68] sm:$0xff]  ;;  %p1696_p2 = por %p1695_p1, %p1694_p12 }
  0x9a   : > { %1401 = vmatprep.subr.bf16.mxu0 %v1400_v27  ;;  %1429 = vmatprep.subr.bf16.mxu1 %v1428_v38  ;;  %v2060_v17 = vpack.c.bf16 %v802_v16, %v801_v15  ;;  %v2064_v20 = vpack.c.bf16 %v804_v19, %v803_v18  ;;  %v2072_v21 = vld [vmem:[%s2177_s2] ss:$0 sm:$0xff]  ;;  %v805_v6 = vld [vmem:[#allocation9 + $0x70] sm:$0xff]  ;;  %v806_v7 = vld [vmem:[#allocation9 + $0x78] sm:$0xff] }
  0x9b   : > { %v1107_v9 = vld [vmem:[%s2179_s4] ss:$0 sm:$0xff]  ;;  %p1697_p4 = pnand %p1696_p2, %p1690_p7 }
  0x9d   : > { %1403 = vmatpush3.bf16.msra.mxu0 %v1400_v27  ;;  %1431 = vmatpush3.bf16.msra.mxu1 %v1428_v38 }
  0x9e   : > { %1405 = vmatprep.subr.bf16.mxu0 %v1404_v33  ;;  %1433 = vmatprep.subr.bf16.mxu1 %v1432_v42 }
  0xa1   : > { %1407 = vmatpush3.bf16.msra.mxu0 %v1404_v33  ;;  %1435 = vmatpush3.bf16.msra.mxu1 %v1432_v42 }
  0xa2   : > { %1409 = vmatprep.subr.bf16.mxu0 %v1408_v39  ;;  %1437 = vmatprep.subr.bf16.mxu1 %v1436_v46 }
  0xa5   : > { %1411 = vmatpush3.bf16.msra.mxu0 %v1408_v39  ;;  %1439 = vmatpush3.bf16.msra.mxu1 %v1436_v46 }
  0xa6   : > { %1441 = vmatprep.subr.bf16.mxu1 %v1440_v63  ;;  %1445 = vmatprep.subr.bf16.mxu0 %v1444_v3 }
  0xa8   : > { %1245 = vmatmul.mubr.f32.vlgmr.msra.gmra.mrb[0].mxu0 %v344_v45 }
  0xa9   : > { %1247 = vmatprep.mubr.f32.mxu0 %v345_v47  ;;  %1443 = vmatpush3.bf16.msra.mxu1 %v1440_v63 }
  0xaa   : > { %1476 = vmatprep.subr.bf16.mxu1 %v1444_v3  ;;  %1447 = vmatpush3.bf16.msra.mxu0 %v1444_v3 }
  0xab   : > { %1449 = vmatprep.subr.bf16.mxu0 %v1448_v5 }
  0xac   : > { %1248 = vmatmul.mubr.f32.gmra.mrb[2].mxu0 %v346_v48 }
  0xad   : > { %1250 = vmatprep.mubr.f32.mxu0 %v347_v49 }
  0xae   : > { %1451 = vmatpush3.bf16.msra.mxu0 %v1448_v5 }
  0xaf   : > { %1453 = vmatprep.subr.bf16.mxu0 %v1452_v8 }
  0xb0   : > { %1251 = vmatmul.mubr.f32.gmra.mrb[4].mxu0 %v348_v50 }
  0xb1   : > { %1253 = vmatprep.mubr.f32.mxu0 %v349_v51 }
  0xb2   : > { %1455 = vmatpush3.bf16.msra.mxu0 %v1452_v8 }
  0xb3   : > { %1457 = vmatprep.subr.bf16.mxu0 %v2053_v11 }
  0xb4   : > { %1254 = vmatmul.mubr.f32.gmra.mrb[6].mxu0 %v350_v52 }
  0xb5   : > { %1256 = vmatprep.mubr.f32.mxu0 %v351_v53 }
  0xb6   : > { %1459 = vmatpush3.bf16.msra.mxu0 %v2053_v11 }
  0xb7   : > { %1461 = vmatprep.subr.bf16.mxu0 %v2056_v14 }
  0xb8   : > { %1257 = vmatmul.mubr.f32.gmra.mrb[8].mxu0 %v352_v54 }
  0xb9   : > { %1259 = vmatprep.mubr.f32.mxu0 %v353_v55 }
  0xba   : > { %1463 = vmatpush3.bf16.msra.mxu0 %v2056_v14 }
  0xbb   : > { %1465 = vmatprep.subr.bf16.mxu0 %v2060_v17 }
  0xbc   : > { %1260 = vmatmul.mubr.f32.gmra.mrb[10].mxu0 %v354_v56 }
  0xbd   : > { %1262 = vmatprep.mubr.f32.mxu0 %v355_v57 }
  0xbe   : > { %1467 = vmatpush3.bf16.msra.mxu0 %v2060_v17 }
  0xbf   : > { %1469 = vmatprep.subr.bf16.mxu0 %v2064_v20 }
  0xc0   : > { %1263 = vmatmul.mubr.f32.gmra.mrb[12].mxu0 %v356_v58 }
  0xc1   : > { %1265 = vmatprep.mubr.f32.mxu0 %v357_v59 }
  0xc2   : > { %1471 = vmatpush3.bf16.msra.mxu0 %v2064_v20 }
  0xc4   : > { %1266 = vmatmul.mubr.f32.gmra.mrb[14].mxu0 %v358_v60 }
 0x17b   : > { %v1246_v22 = vpop.f32.mrb[0].mxu0 }
 0x17c   : > { %v454_v23 = vadd.f32 %v1246_v22, %v2072_v21  ;;  %v448_v24 = vpop.f32.mrb[1].mxu0 }
 0x17d   : > { %v449_v25 = vadd.f32 %v2072_v21, %v448_v24 }
 0x17e   : > { %v560_v28 = vmax.f32 %v454_v23, 0.0 }
 0x17f   : > { %v1249_v26 = vpop.f32.mrb[2].mxu0  ;;  %v559_v27 = vmax.f32 %v449_v25, 0.0 }
 0x180   : > { %v464_v29 = vadd.f32 %v1249_v26, %v2072_v21  ;;  %v458_v30 = vpop.f32.mrb[3].mxu0 }
 0x181   : > { %v459_v31 = vadd.f32 %v2072_v21, %v458_v30  ;;  %1300 = vmatprep.mubr.f32.mxu1 %v559_v27 }
 0x182   : > { %1301 = vmatmul.mubr.f32.vlgmr.msra.gmra.mrb[0].mxu1 %v560_v28  ;;  %v562_v34 = vmax.f32 %v464_v29, 0.0 }
 0x183   : > { %v561_v32 = vmax.f32 %v459_v31, 0.0  ;;  %v1252_v33 = vpop.f32.mrb[4].mxu0  ;;  %1484 = vmatpush3.bf16.msra.mxu1 %v1444_v3 }
 0x184   : > { %v474_v35 = vadd.f32 %v1252_v33, %v2072_v21  ;;  %v468_v36 = vpop.f32.mrb[5].mxu0  ;;  %1477 = vmatprep.subr.bf16.mxu1 %v1448_v5 }
 0x185   : > { %v469_v37 = vadd.f32 %v2072_v21, %v468_v36  ;;  %1303 = vmatprep.mubr.f32.mxu1 %v561_v32 }
 0x186   : > { %1304 = vmatmul.mubr.f32.gmra.mrb[2].mxu1 %v562_v34  ;;  %v564_v40 = vmax.f32 %v474_v35, 0.0 }
 0x187   : > { %v563_v38 = vmax.f32 %v469_v37, 0.0  ;;  %v1255_v39 = vpop.f32.mrb[6].mxu0  ;;  %1485 = vmatpush3.bf16.msra.mxu1 %v1448_v5 }
 0x188   : > { %v484_v41 = vadd.f32 %v1255_v39, %v2072_v21  ;;  %v478_v42 = vpop.f32.mrb[7].mxu0  ;;  %1478 = vmatprep.subr.bf16.mxu1 %v1452_v8 }
 0x189   : > { %v479_v43 = vadd.f32 %v2072_v21, %v478_v42  ;;  %1306 = vmatprep.mubr.f32.mxu1 %v563_v38 }
 0x18a   : > { %1307 = vmatmul.mubr.f32.gmra.mrb[4].mxu1 %v564_v40  ;;  %v566_v46 = vmax.f32 %v484_v41, 0.0 }
 0x18b   : > { %v565_v44 = vmax.f32 %v479_v43, 0.0  ;;  %v1258_v45 = vpop.f32.mrb[8].mxu0  ;;  %1486 = vmatpush3.bf16.msra.mxu1 %v1452_v8  ;;  %v1472_v8 = vpack.c.bf16 %v806_v7, %v805_v6 }
 0x18c   : > { %v494_v47 = vadd.f32 %v1258_v45, %v2072_v21  ;;  %v488_v48 = vpop.f32.mrb[9].mxu0  ;;  %1479 = vmatprep.subr.bf16.mxu1 %v2053_v11 }
 0x18d   : > { %v489_v49 = vadd.f32 %v2072_v21, %v488_v48  ;;  %1309 = vmatprep.mubr.f32.mxu1 %v565_v44  ;;  %1473 = vmatprep.subr.bf16.mxu0 %v1472_v8 }
 0x18e   : > { %1310 = vmatmul.mubr.f32.gmra.mrb[6].mxu1 %v566_v46  ;;  %v568_v52 = vmax.f32 %v494_v47, 0.0  ;;  %1475 = vmatpush3.bf16.msra.mxu0 %v1472_v8 }
 0x18f   : > { %v567_v50 = vmax.f32 %v489_v49, 0.0  ;;  %v1261_v51 = vpop.f32.mrb[10].mxu0  ;;  %1487 = vmatpush3.bf16.msra.mxu1 %v2053_v11 }
 0x190   : > { %v504_v53 = vadd.f32 %v1261_v51, %v2072_v21  ;;  %v498_v54 = vpop.f32.mrb[11].mxu0  ;;  %1480 = vmatprep.subr.bf16.mxu1 %v2056_v14 }
 0x191   : > { %v499_v55 = vadd.f32 %v2072_v21, %v498_v54  ;;  %1312 = vmatprep.mubr.f32.mxu1 %v567_v50 }
 0x192   : > { %1313 = vmatmul.mubr.f32.gmra.mrb[8].mxu1 %v568_v52  ;;  %v570_v58 = vmax.f32 %v504_v53, 0.0 }
 0x193   : > { %v569_v56 = vmax.f32 %v499_v55, 0.0  ;;  %v1264_v57 = vpop.f32.mrb[12].mxu0  ;;  %1488 = vmatpush3.bf16.msra.mxu1 %v2056_v14 }
 0x194   : > { %v514_v59 = vadd.f32 %v1264_v57, %v2072_v21  ;;  %v508_v60 = vpop.f32.mrb[13].mxu0  ;;  %1481 = vmatprep.subr.bf16.mxu1 %v2060_v17 }
 0x195   : > { %v509_v61 = vadd.f32 %v2072_v21, %v508_v60  ;;  %1315 = vmatprep.mubr.f32.mxu1 %v569_v56 }
 0x196   : > { %1316 = vmatmul.mubr.f32.gmra.mrb[10].mxu1 %v570_v58  ;;  %v572_v0 = vmax.f32 %v514_v59, 0.0  ;;  %v1108_v58 = vld [vmem:[%s2181_s6] ss:$0 sm:$0xff] }
 0x197   : > { %v571_v62 = vmax.f32 %v509_v61, 0.0  ;;  %v1267_v63 = vpop.f32.mrb[14].mxu0  ;;  %1489 = vmatpush3.bf16.msra.mxu1 %v2060_v17 }
 0x198   : > { %v524_v1 = vadd.f32 %v1267_v63, %v2072_v21  ;;  %v518_v2 = vpop.f32.mrb[15].mxu0  ;;  %1482 = vmatprep.subr.bf16.mxu1 %v2064_v20 }
 0x199   : > { %v519_v3 = vadd.f32 %v2072_v21, %v518_v2  ;;  %1318 = vmatprep.mubr.f32.mxu1 %v571_v62 }
 0x19a   : > { %1319 = vmatmul.mubr.f32.gmra.mrb[12].mxu1 %v572_v0  ;;  %v574_v5 = vmax.f32 %v524_v1, 0.0 }
 0x19b   : > { %v573_v4 = vmax.f32 %v519_v3, 0.0  ;;  %1490 = vmatpush3.bf16.msra.mxu1 %v2064_v20 }
 0x19c   : > { %1483 = vmatprep.subr.bf16.mxu1 %v1472_v8 }
 0x19d   : > { %1321 = vmatprep.mubr.f32.mxu1 %v573_v4 }
 0x19e   : > { %1322 = vmatmul.mubr.f32.gmra.mrb[14].mxu1 %v574_v5 }
 0x19f   : > { %1491 = vmatpush3.bf16.msra.mxu1 %v1472_v8 }
 0x255   : > { %v1302_v10 = vpop.f32.mrb[0].mxu1 }
 0x256   : > { %v670_v11 = vadd.f32 %v1302_v10, %v1107_v9  ;;  %v664_v12 = vpop.f32.mrb[1].mxu1 }
 0x257   : > { %v665_v13 = vadd.f32 %v1107_v9, %v664_v12 }
 0x258   : > { %v776_v16 = vmax.f32 %v670_v11, 0.0 }
 0x259   : > { %v775_v14 = vmax.f32 %v665_v13, 0.0  ;;  %v1305_v15 = vpop.f32.mrb[2].mxu1 }
 0x25a   : > { %v680_v17 = vadd.f32 %v1305_v15, %v1107_v9  ;;  %v674_v18 = vpop.f32.mrb[3].mxu1 }
 0x25b   : > { %v675_v19 = vadd.f32 %v1107_v9, %v674_v18  ;;  %1356 = vmatprep.mubr.f32.mxu0 %v775_v14 }
 0x25c   : > { %1357 = vmatmul.mubr.f32.vlgmr.msra.gmra.mrb[16].mxu0 %v776_v16  ;;  %v778_v22 = vmax.f32 %v680_v17, 0.0 }
 0x25d   : > { %v777_v20 = vmax.f32 %v675_v19, 0.0  ;;  %v1308_v21 = vpop.f32.mrb[4].mxu1 }
 0x25e   : > { %v690_v23 = vadd.f32 %v1308_v21, %v1107_v9  ;;  %v684_v24 = vpop.f32.mrb[5].mxu1 }
 0x25f   : > { %v685_v25 = vadd.f32 %v1107_v9, %v684_v24  ;;  %1359 = vmatprep.mubr.f32.mxu0 %v777_v20 }
 0x260   : > { %1360 = vmatmul.mubr.f32.gmra.mrb[18].mxu0 %v778_v22  ;;  %v780_v28 = vmax.f32 %v690_v23, 0.0 }
 0x261   : > { %v779_v26 = vmax.f32 %v685_v25, 0.0  ;;  %v1311_v27 = vpop.f32.mrb[6].mxu1 }
 0x262   : > { %v700_v29 = vadd.f32 %v1311_v27, %v1107_v9  ;;  %v694_v30 = vpop.f32.mrb[7].mxu1 }
 0x263   : > { %v695_v31 = vadd.f32 %v1107_v9, %v694_v30  ;;  %1362 = vmatprep.mubr.f32.mxu0 %v779_v26 }
 0x264   : > { %1363 = vmatmul.mubr.f32.gmra.mrb[20].mxu0 %v780_v28  ;;  %v782_v34 = vmax.f32 %v700_v29, 0.0 }
 0x265   : > { %v781_v32 = vmax.f32 %v695_v31, 0.0  ;;  %v1314_v33 = vpop.f32.mrb[8].mxu1 }
 0x266   : > { %v710_v35 = vadd.f32 %v1314_v33, %v1107_v9  ;;  %v704_v36 = vpop.f32.mrb[9].mxu1 }
 0x267   : > { %v705_v37 = vadd.f32 %v1107_v9, %v704_v36  ;;  %1365 = vmatprep.mubr.f32.mxu0 %v781_v32 }
 0x268   : > { %1366 = vmatmul.mubr.f32.gmra.mrb[22].mxu0 %v782_v34  ;;  %v784_v40 = vmax.f32 %v710_v35, 0.0 }
 0x269   : > { %v783_v38 = vmax.f32 %v705_v37, 0.0  ;;  %v1317_v39 = vpop.f32.mrb[10].mxu1 }
 0x26a   : > { %v720_v41 = vadd.f32 %v1317_v39, %v1107_v9  ;;  %v714_v42 = vpop.f32.mrb[11].mxu1 }
 0x26b   : > { %v715_v43 = vadd.f32 %v1107_v9, %v714_v42  ;;  %1368 = vmatprep.mubr.f32.mxu1 %v783_v38 }
 0x26c   : > { %1369 = vmatmul.mubr.f32.vlgmr.msra.gmra.mrb[16].mxu1 %v784_v40  ;;  %v786_v46 = vmax.f32 %v720_v41, 0.0 }
 0x26d   : > { %v785_v44 = vmax.f32 %v715_v43, 0.0  ;;  %v1320_v45 = vpop.f32.mrb[12].mxu1 }
 0x26e   : > { %v730_v47 = vadd.f32 %v1320_v45, %v1107_v9  ;;  %v724_v48 = vpop.f32.mrb[13].mxu1 }
 0x26f   : > { %v725_v49 = vadd.f32 %v1107_v9, %v724_v48  ;;  %1371 = vmatprep.mubr.f32.mxu1 %v785_v44 }
 0x270   : > { %1372 = vmatmul.mubr.f32.gmra.mrb[18].mxu1 %v786_v46  ;;  %v788_v52 = vmax.f32 %v730_v47, 0.0 }
 0x271   : > { %v787_v50 = vmax.f32 %v725_v49, 0.0  ;;  %v1323_v51 = vpop.f32.mrb[14].mxu1 }
 0x272   : > { %v740_v53 = vadd.f32 %v1323_v51, %v1107_v9  ;;  %v734_v54 = vpop.f32.mrb[15].mxu1 }
 0x273   : > { %v735_v55 = vadd.f32 %v1107_v9, %v734_v54  ;;  %1374 = vmatprep.mubr.f32.mxu1 %v787_v50 }
 0x274   : > { %1375 = vmatmul.mubr.f32.gmra.mrb[20].mxu1 %v788_v52  ;;  %v790_v57 = vmax.f32 %v740_v53, 0.0 }
 0x275   : > { %v789_v56 = vmax.f32 %v735_v55, 0.0 }
 0x277   : > { %1377 = vmatprep.mubr.f32.mxu1 %v789_v56 }
 0x278   : > { %1378 = vmatmul.mubr.f32.gmra.mrb[22].mxu1 %v790_v57 }
 0x32f   : > { %v1358_v59 = vpop.f32.mrb[16].mxu0 }
 0x330   : > { %v886_v60 = vadd.f32 %v1358_v59, %v1108_v58  ;;  %v880_v61 = vpop.f32.mrb[17].mxu0 }
 0x331   : > { %v881_v62 = vadd.f32 %v1108_v58, %v880_v61 }
 0x332   : > { %960 = vst [vmem:[%s2106_s12 + $0x8] sm:$0xff] %v886_v60 }
 0x333   : > { %959 = vst [vmem:[%s2106_s12] sm:$0xff] %v881_v62  ;;  %v1361_v63 = vpop.f32.mrb[18].mxu0 }
 0x334   : > { %v896_v0 = vadd.f32 %v1361_v63, %v1108_v58  ;;  %v890_v1 = vpop.f32.mrb[19].mxu0 }
 0x335   : > { %v891_v2 = vadd.f32 %v1108_v58, %v890_v1 }
 0x336   : > { %962 = vst [vmem:[%s2106_s12 + $0x18] sm:$0xff] %v896_v0 }
 0x337   : > { %961 = vst [vmem:[%s2106_s12 + $0x10] sm:$0xff] %v891_v2  ;;  %v1364_v3 = vpop.f32.mrb[20].mxu0 }
 0x338   : > { %v906_v4 = vadd.f32 %v1364_v3, %v1108_v58  ;;  %v900_v5 = vpop.f32.mrb[21].mxu0 }
 0x339   : > { %v901_v6 = vadd.f32 %v1108_v58, %v900_v5 }
 0x33a   : > { %964 = vst [vmem:[%s2106_s12 + $0x28] sm:$0xff] %v906_v4 }
 0x33b   : > { %963 = vst [vmem:[%s2106_s12 + $0x20] sm:$0xff] %v901_v6  ;;  %v1367_v7 = vpop.f32.mrb[22].mxu0 }
 0x33c   : > { %v916_v8 = vadd.f32 %v1367_v7, %v1108_v58  ;;  %v910_v9 = vpop.f32.mrb[23].mxu0 }
 0x33d   : > { %v911_v10 = vadd.f32 %v1108_v58, %v910_v9 }
 0x33e   : > { %966 = vst [vmem:[%s2106_s12 + $0x38] sm:$0xff] %v916_v8 }
 0x33f   : > { %965 = vst [vmem:[%s2106_s12 + $0x30] sm:$0xff] %v911_v10  ;;  %v1370_v11 = vpop.f32.mrb[16].mxu1 }
 0x340   : > { %v926_v12 = vadd.f32 %v1370_v11, %v1108_v58  ;;  %v920_v13 = vpop.f32.mrb[17].mxu1 }
 0x341   : > { %v921_v14 = vadd.f32 %v1108_v58, %v920_v13 }
 0x342   : > { %968 = vst [vmem:[%s2106_s12 + $0x48] sm:$0xff] %v926_v12 }
 0x343   : > { %967 = vst [vmem:[%s2106_s12 + $0x40] sm:$0xff] %v921_v14  ;;  %v1373_v15 = vpop.f32.mrb[18].mxu1 }
 0x344   : > { %v936_v16 = vadd.f32 %v1373_v15, %v1108_v58  ;;  %v930_v17 = vpop.f32.mrb[19].mxu1 }
 0x345   : > { %v931_v18 = vadd.f32 %v1108_v58, %v930_v17 }
 0x346   : > { %970 = vst [vmem:[%s2106_s12 + $0x58] sm:$0xff] %v936_v16 }
 0x347   : > { %969 = vst [vmem:[%s2106_s12 + $0x50] sm:$0xff] %v931_v18  ;;  %v1376_v19 = vpop.f32.mrb[20].mxu1 }
 0x348   : > { %v946_v20 = vadd.f32 %v1376_v19, %v1108_v58  ;;  %v940_v21 = vpop.f32.mrb[21].mxu1 }
 0x349   : > { %v941_v22 = vadd.f32 %v1108_v58, %v940_v21 }
 0x34a   : > { %972 = vst [vmem:[%s2106_s12 + $0x68] sm:$0xff] %v946_v20 }
 0x34b   : > { %971 = vst [vmem:[%s2106_s12 + $0x60] sm:$0xff] %v941_v22  ;;  %v1379_v23 = vpop.f32.mrb[22].mxu1 }
 0x34c   : > { %v956_v24 = vadd.f32 %v1379_v23, %v1108_v58  ;;  %v950_v25 = vpop.f32.mrb[23].mxu1 }
 0x34d   : > { %v951_v26 = vadd.f32 %v1108_v58, %v950_v25 }
 0x34e   : > { %974 = vst [vmem:[%s2106_s12 + $0x78] sm:$0xff] %v956_v24 }
 0x34f   : > { %973 = vst [vmem:[%s2106_s12 + $0x70] sm:$0xff] %v951_v26 }
 0x350   : > { %1700 = shalt.err (!%p1697_p4)
}
 0x351   : > { %s1701_s13 = scalar_lea.hbm %s2127_s23, 2048  ;;  %s1705_s14 = scalar_lea.hbm %s2182_s7, 4096 }
 0x352   : > { %p1702_p9 = scmp.ne.s32.totalorder %s2127_s23, %s1701_s13  ;;  %p1706_p8 = scmp.lt.u32.totalorder %s2127_s23, %s2182_s7 }
 0x353   : > { %p1707_p13 = scmp.lt.u32.totalorder %s1705_s14, %s1701_s13  ;;  %p1709_p10 = scmp.lt.u32.totalorder %s1701_s13, %s2127_s23 }
 0x354   : > { %p1703_p0 = pnand %p1702_p9, %p1966_p5 }
 0x355   : > { %p1708_p6 = por %p1707_p13, %p1706_p8 }
 0x356   : > { %p1704_p11 = pneg %p1703_p0 }
 0x357   : > { %p1710_p3 = por %p1709_p10, %p1708_p6 }
 0x359   : > { %p1711_p7 = pnand %p1710_p3, %p1704_p11 }
 0x35b   : > { %1714 = shalt.err (!%p1711_p7)
}
 0x35c   : > { %s1770_s16 = smov 128   ;;  %s1771_s29 = smov 8  }
 0x35d   : > { %1506 = dma.vmem_to_hbm [thread:$0]  (%p1966_p5), %s2129_s21, 2048, %s2127_s23, %s976_s28, %s1770_s16, %s1770_s16, %s1771_s29  }
 0x35e PF: > { %s2202_s11 = sld [smem:[#allocation16_spill]]  ;;  %s1004_s8 = sand.u32 1, %s1749_s24  }
 0x35f   : > { %p2204_p1 = scmp.ge.s32.totalorder %s1761_s27, 2  ;;  %s1005_s30 = scalar_lea.sflag [#allocation5], %s1004_s8 }
 0x364   : > { %p2203_p12 = scmp.ne.s32.totalorder %s2202_s11, 0 }
 0x366   : > { %p1523_p2 = pnand %p2204_p1, %p2203_p12 }
 0x368   : > { %1744 = dma.done.wait (!%p1523_p2), %s1005_s30, 2048  }
 0x369   : > { %1746 = vsyncadd (!%p1523_p2), %s1005_s30, 4294965248  ;;  %p22_p4 = scmp.ge.s32.totalorder %s1952_s22, 4   ;;  %s2205_s24 = smov %s1753_s25 }
 0x36a   : > { %s2206_s25 = smov %s1757_s26  ;;  %s2207_s26 = smov %s1962_s18 }
 0x36b   : > { %s2208_s27 = smov %s1952_s22  ;;  %24 = sbr.rel (!%p22_p4) target bundleno = 7 (0x7), region = 105 }
 0x372   :  { %1010 = vsyncpa [#allocation4], 1 }
 0x373   :  { %1012 = vsyncpa [#allocation4 + $0x1], 1 }
 0x374   :  { %1013 = vsyncpa [#allocation7], 1 }
 0x375   :  { %1014 = vsyncpa [#allocation10], 1 }
 0x376   :  { %1015 = vsyncpa [#allocation5], 1 }
 0x377   :  { %1017 = vsyncpa [#allocation5 + $0x1], 1 }

// kernel: tpu_custom_call.1
= control target key start
LH: loop header
LB: loop body
LE: loop exit
PB: predicated region body
PF: predicated region fallthrough
CT: control target
= control target key end

     0   :  { %12 = vsyncpa [#allocation4], 0  ;;  %s2175_s0 = inlined_call_operand.hbm [shape: f32[256,128], index: 0, kind: input, shape index: {}]   ;;  %s2176_s1 = inlined_call_operand.hbm [shape: f32[128,128], index: 1, kind: input, shape index: {}]   ;;  %s2177_s2 = inlined_call_operand.vmem [shape: f32[1,128], index: 2, kind: input, shape index: {}]   ;;  %s2178_s3 = inlined_call_operand.hbm [shape: f32[128,128], index: 3, kind: input, shape index: {}]   ;;  %s2179_s4 = inlined_call_operand.vmem [shape: f32[1,128], index: 4, kind: input, shape index: {}]   ;;  %s2180_s5 = inlined_call_operand.hbm [shape: f32[128,128], index: 5, kind: input, shape index: {}]   ;;  %s2181_s6 = inlined_call_operand.vmem [shape: f32[1,128], index: 6, kind: input, shape index: {}]   ;;  %s2182_s7 = inlined_call_operand.hbm [shape: f32[256,128], index: 7, kind: output, shape index: {}]  }
   0x1   :  { %14 = vsyncpa [#allocation4 + $0x1], 0 }
   0x2   :  { %15 = vsyncpa [#allocation7], 0 }
   0x3   :  { %16 = vsyncpa [#allocation10], 0 }
   0x4   :  { %17 = vsyncpa [#allocation5], 0 }
   0x5   :  { %19 = vsyncpa [#allocation5 + $0x1], 0  ;;  %s1812_s24 = smov 0   ;;  %s1814_s25 = smov 0  }
   0x6   :  { %s1816_s26 = smov 0   ;;  %s1818_s27 = smov 0  }
   0x7 LB: > { %s1833_s28 = sadd.s32 4294967295, %s1761_s27   ;;  %s1091_s29 = sadd.s32 4294967294, %s1761_s27   ;;  %s1761_s27 = sphi %s1818_s27, %s2208_s27   ;;  %s1757_s26 = sphi %s1816_s26, %s2207_s26   ;;  %s1753_s25 = sphi %s1814_s25, %s2206_s25   ;;  %s1749_s24 = sphi %s1812_s24, %s2205_s24  }
   0x8   : > { %p45_p0 = scmp.ne.s32.totalorder %s1753_s25, %s1749_s24  ;;  %p2183_p1 = scmp.eq.s32.totalorder %s1833_s28, 0 }
   0x9   : > { %p201_p3 = scmp.eq.s32.totalorder %s1091_s29, 1  ;;  %p1092_p5 = scmp.ge.s32.totalorder %s1761_s27, 1 }
   0xa   : > { %p1842_p4 = por %p2183_p1, %p45_p0  ;;  %p208_p7 = scmp.lt.s32.totalorder %s1761_s27, 3 }
   0xb   : > { %p1847_p6 = por %p201_p3, %p45_p0  ;;  %s1763_s10 = smov [#allocation6]  }
   0xc   : > { %s2187_s30 = scalar_select %p1842_p4, 1, 0 }
   0xd   : > { %s2188_s8 = scalar_select %p1847_p6, 1, 0 }
   0xe   : > { %p1852_p8 = pnand %p1092_p5, %p208_p7  ;;  %s220_s11 = sshll.u32 %s1763_s10, 4  ;;  %s1856_s11 = int_to_ptr.vmem [resolvable:$true] %s220_s11 }
   0xf   : > { %2189 = sst [smem:[#allocation16_spill]] %s2188_s8  ;;  %s1764_s13 = smov [#allocation8]  }
  0x10   : > { %s2190_s9 = scalar_select %p1852_p8, 1, 0 }
  0x11   : > { %p1508_p9 = pneg %p1852_p8  ;;  %s236_s14 = sshll.u32 %s1764_s13, 4  ;;  %s1867_s14 = int_to_ptr.vmem [resolvable:$true] %s236_s14 }
  0x12   : > { %s1765_s15 = smov [#allocation9]   ;;  %s1573_s19 = scalar_lea.hbm %s2176_s1, 2048 }
  0x13   : > { %p1863_p11 = pnand %p1508_p9, %p2183_p1  ;;  %s1869_s16 = sshll.u32 %s1765_s15, 4  ;;  %s253_s16 = int_to_ptr.vmem [resolvable:$true] %s1869_s16 }
  0x14   : > { %p1574_p12 = scmp.ne.s32.totalorder %s2176_s1, %s1573_s19  ;;  %p1580_p5 = scmp.lt.u32.totalorder %s1573_s19, %s2176_s1 }
  0x15   : > { %p1879_p13 = pneg %p1863_p11 }
  0x17   : > { %p1576_p0 = pnand %p1879_p13, %p1574_p12 }
  0x19   : > { %p1577_p3 = pneg %p1576_p0 }
  0x1b   : > { %p1582_p7 = pnand %p1580_p5, %p1577_p3 }
  0x1d   : > { %1585 = shalt.err (!%p1582_p7)
}
  0x1e   : > { %s1586_s10 = scalar_lea.vmem %s1856_s11, 2048  ;;  %p1594_p2 = scmp.lt.s32.totalorder %s1856_s11, %s1856_s11 }
  0x1f   : > { %p1587_p9 = scmp.ne.s32.totalorder %s1856_s11, %s1586_s10  ;;  %p1595_p6 = scmp.lt.s32.totalorder %s1586_s10, %s1586_s10 }
  0x21   : > { %p1589_p10 = pnand %p1587_p9, %p1879_p13  ;;  %p1596_p12 = por %p1595_p6, %p1594_p2 }
  0x23   : > { %p1590_p1 = pneg %p1589_p10 }
  0x25   : > { %p1597_p0 = pnand %p1596_p12, %p1590_p1 }
  0x27   : > { %1600 = shalt.err (!%p1597_p0)
}
  0x28   : > { %s1766_s13 = smov 128   ;;  %s1767_s15 = smov 8  }
  0x29   : > { %1511 = dma.hbm_to_vmem [thread:$0]  (!%p1863_p11), %s2176_s1, 2048, %s1856_s11, [#allocation7], %s1766_s13, %s1766_s13, %s1767_s15  }
  0x2a   : > { %s1601_s21 = scalar_lea.hbm %s2178_s3, 2048 }
  0x2b   : > { %p1602_p1 = scmp.ne.s32.totalorder %s2178_s3, %s1601_s21  ;;  %p1608_p10 = scmp.lt.u32.totalorder %s1601_s21, %s2178_s3 }
  0x2d   : > { %p1604_p2 = pnand %p1602_p1, %p1879_p13 }
  0x2f   : > { %p1605_p6 = pneg %p1604_p2 }
  0x31   : > { %p1610_p3 = pnand %p1608_p10, %p1605_p6 }
  0x33   : > { %1613 = shalt.err (!%p1610_p3)
}
  0x34   : > { %s1614_s11 = scalar_lea.vmem %s1867_s14, 2048  ;;  %p1622_p12 = scmp.lt.s32.totalorder %s1867_s14, %s1867_s14 }
  0x35   : > { %p1615_p5 = scmp.ne.s32.totalorder %s1867_s14, %s1614_s11  ;;  %p1623_p0 = scmp.lt.s32.totalorder %s1614_s11, %s1614_s11 }
  0x37   : > { %p1617_p7 = pnand %p1615_p5, %p1879_p13  ;;  %p1624_p1 = por %p1623_p0, %p1622_p12 }
  0x39   : > { %p1618_p9 = pneg %p1617_p7 }
  0x3b   : > { %p1625_p2 = pnand %p1624_p1, %p1618_p9 }
  0x3d   : > { %1628 = shalt.err (!%p1625_p2)
}
  0x3e   : > { %1514 = dma.hbm_to_vmem [thread:$0]  (!%p1863_p11), %s2178_s3, 2048, %s1867_s14, [#allocation7], %s1766_s13, %s1766_s13, %s1767_s15  }
  0x3f   : > { %s1629_s20 = scalar_lea.hbm %s2180_s5, 2048 }
  0x40   : > { %p1630_p6 = scmp.ne.s32.totalorder %s2180_s5, %s1629_s20  ;;  %p1636_p5 = scmp.lt.u32.totalorder %s1629_s20, %s2180_s5 }
  0x42   : > { %p1632_p10 = pnand %p1630_p6, %p1879_p13 }
  0x44   : > { %p1633_p3 = pneg %p1632_p10 }
  0x46   : > { %p1638_p7 = pnand %p1636_p5, %p1633_p3 }
  0x48   : > { %1641 = shalt.err (!%p1638_p7)
}
  0x49   : > { %s1642_s11 = scalar_lea.vmem %s253_s16, 2048  ;;  %p1650_p1 = scmp.lt.s32.totalorder %s253_s16, %s253_s16 }
  0x4a   : > { %p1643_p9 = scmp.ne.s32.totalorder %s253_s16, %s1642_s11  ;;  %p1651_p2 = scmp.lt.s32.totalorder %s1642_s11, %s1642_s11 }
  0x4c   : > { %p1645_p12 = pnand %p1643_p9, %p1879_p13  ;;  %p1652_p4 = por %p1651_p2, %p1650_p1 }
  0x4e   : > { %p1646_p0 = pneg %p1645_p12 }
  0x50   : > { %p1653_p8 = pnand %p1652_p4, %p1646_p0 }
  0x52   : > { %1656 = shalt.err (!%p1653_p8)
}
  0x53   : > { %1517 = dma.hbm_to_vmem [thread:$0]  (!%p1863_p11), %s2180_s5, 2048, %s253_s16, [#allocation10], %s1766_s13, %s1766_s13, %s1767_s15  }
  0x54   : > { %s1952_s22 = sadd.s32 1, %s1761_s27   ;;  %s32_s17 = sadd.s32 1, %s1757_s26 }
  0x55   : > { %s29_s12 = ssub.s32 %s1761_s27, %s1952_s22  ;;  %p39_p8 = scmp.ne.s32.totalorder %s1757_s26, %s1753_s25 }
  0x56   : > { %p30_p4 = scmp.eq.s32.totalorder %s29_s12, 0  ;;  %p40_p13 = scmp.eq.s32.totalorder %s1761_s27, 0 }
  0x57   : > { %p1529_p6 = scmp.lt.s32.totalorder %s1761_s27, 2  ;;  %p2193_p3 = scmp.eq.s32.totalorder %s1833_s28, 1 }
  0x58   : > { %s1962_s18 = scalar_select %p30_p4, %s1757_s26, %s32_s17  }
  0x59   : > { %p41_p10 = por %p40_p13, %p39_p8  ;;  %p1966_p5 = por %p2193_p3, %p39_p8 }
  0x5a   : > { %s269_s20 = sand.u32 1, %s1757_s26   ;;  %s1114_s21 = sshll.u32 %s1761_s27, 11 }
  0x5b   : > { %s1097_s16 = sshll.u32 %s269_s20, 7  ;;  %s1975_s10 = scalar_lea.hbm %s2175_s0, %s1114_s21 }
  0x5c   : > { %s273_s11 = scalar_lea.vmem [#allocation3], %s1097_s16  ;;  %p1977_p11 = pnand %p1529_p6, %p41_p10 }
  0x5d   : > { %s280_s14 = sshll.u32 %s273_s11, 4  ;;  %s1983_s12 = scalar_lea.sflag [#allocation4], %s269_s20  ;;  %s1981_s14 = int_to_ptr.vmem [resolvable:$true] %s280_s14 }
  0x5e   : > { %s1657_s17 = scalar_lea.hbm %s1975_s10, 2048  ;;  %p1659_p9 = pneg %p1977_p11 }
  0x5f   : > { %p1658_p7 = scmp.ne.s32.totalorder %s1975_s10, %s1657_s17  ;;  %s1662_s23 = scalar_lea.hbm %s2175_s0, 4096 }
  0x60   : > { %p1663_p1 = scmp.lt.u32.totalorder %s1975_s10, %s2175_s0  ;;  %p1664_p2 = scmp.lt.u32.totalorder %s1662_s23, %s1657_s17 }
  0x61   : > { %p1660_p12 = pnand %p1659_p9, %p1658_p7  ;;  %p1666_p8 = scmp.lt.u32.totalorder %s1657_s17, %s1975_s10 }
  0x62   : > { %p1665_p4 = por %p1664_p2, %p1663_p1 }
  0x63   : > { %p1661_p0 = pneg %p1660_p12 }
  0x64   : > { %p1667_p13 = por %p1666_p8, %p1665_p4 }
  0x66   : > { %p1668_p6 = pnand %p1667_p13, %p1661_p0 }
  0x68   : > { %1671 = shalt.err (!%p1668_p6)
}
  0x69   : > { %s1672_s20 = scalar_lea.vmem %s1981_s14, 2048  ;;  %s1768_s21 = smov [#allocation3]  }
  0x6a   : > { %p1673_p10 = scmp.ne.s32.totalorder %s1981_s14, %s1672_s20  ;;  %s1677_s16 = sshll.u32 %s1768_s21, 4  ;;  %s1678_s16 = int_to_ptr.vmem [resolvable:$false] %s1677_s16 }
  0x6b   : > { %s1679_s29 = scalar_lea.vmem %s1678_s16, 4096  ;;  %p1680_p12 = scmp.lt.s32.totalorder %s1981_s14, %s1678_s16 }
  0x6c   : > { %p1675_p3 = pnand %p1673_p10, %p1659_p9  ;;  %p1681_p1 = scmp.lt.s32.totalorder %s1679_s29, %s1672_s20 }
  0x6e   : > { %p1676_p7 = pneg %p1675_p3  ;;  %p1682_p2 = por %p1681_p1, %p1680_p12 }
  0x70   : > { %p1683_p4 = pnand %p1682_p2, %p1676_p7 }
  0x72   : > { %1686 = shalt.err (!%p1683_p4)
}
  0x73   : > { %1521 = dma.hbm_to_vmem [thread:$0]  (!%p1977_p11), %s1975_s10, 2048, %s1981_s14, %s1983_s12, %s1766_s13, %s1766_s13, %s1767_s15  }
  0x74   : > { %p2196_p9 = scmp.ne.s32.totalorder %s2190_s9, 0 }
  0x75   : > { %s2017_s17 = sand.u32 (!%p2196_p9), 1, %s1753_s25   ;;  %p2197_p0 = scmp.ne.s32.totalorder (!%p2196_p9), %s2187_s30, 0 }
  0x76   : > { %292 = sbr.rel (%p2196_p9) target bundleno = 862 (0x35e), region = 48  ;;  %s1101_s23 = sshll.u32 (!%p2196_p9), %s2017_s17, 7 }
  0x77   : > { %s295_s11 = scalar_lea.sflag (!%p2196_p9), [#allocation4], %s2017_s17  ;;  %s2023_s8 = scalar_lea.vmem (!%p2196_p9), [#allocation3], %s1101_s23 }
  0x7d   : > { %1732 = dma.done.wait (%p2197_p0), %s295_s11, 2048  }
  0x7e   : > { %1734 = vsyncadd (%p2197_p0), %s295_s11, 4294965248  ;;  %p2198_p11 = scmp.eq.s32.totalorder %s1833_s28, 0 }
  0x80   : > { %1736 = dma.done.wait (%p2198_p11), [#allocation7], 4096   ;;  %p2199_p8 = pmov %p2198_p11 }
  0x82   : > { %1738 = vsyncadd (%p2199_p8), [#allocation7], 4294963200  ;;  %p2200_p13 = pmov %p2199_p8 }
  0x83   : > { %p2201_p6 = pmov %p2199_p8 }
  0x84   : > { %1740 = dma.done.wait (%p2200_p13), [#allocation10], 2048  }
  0x85   : > { %1742 = vsyncadd (%p2201_p6), [#allocation10], 4294965248  ;;  %v359_v0 = vld [vmem:[#allocation6] sm:$0xff]  ;;  %v360_v1 = vld [vmem:[#allocation6 + $0x8] sm:$0xff]  ;;  %s2106_s12 = scalar_lea.vmem [#allocation11], %s1101_s23  ;;  %s1115_s20 = sshll.u32 %s1833_s28, 11 }
  0x86   : > { %v361_v2 = vld [vmem:[#allocation6 + $0x10] sm:$0xff]  ;;  %v1380_v3 = vpack.c.bf16 %v360_v1, %v359_v0  ;;  %v362_v4 = vld [vmem:[#allocation6 + $0x18] sm:$0xff]  ;;  %v363_v6 = vld [vmem:[#allocation6 + $0x20] sm:$0xff]  ;;  %s989_s21 = sshll.u32 %s2106_s12, 4  ;;  %s2127_s23 = scalar_lea.hbm %s2182_s7, %s1115_s20  ;;  %s2129_s21 = int_to_ptr.vmem [resolvable:$true] %s989_s21 }
  0x87   : > { %v1384_v5 = vpack.c.bf16 %v362_v4, %v361_v2  ;;  %v364_v7 = vld [vmem:[#allocation6 + $0x28] sm:$0xff]  ;;  %v343_v9 = vld [vmem:[%s2023_s8] sm:$0xff]  ;;  %v365_v10 = vld [vmem:[#allocation6 + $0x30] sm:$0xff]  ;;  %s976_s28 = scalar_lea.sflag [#allocation5], %s2017_s17  ;;  %s1687_s11 = scalar_lea.vmem %s2129_s21, 2048 }
  0x88   : > { %1381 = vmatprep.subr.bf16.mxu0 %v1380_v3  ;;  %v1388_v8 = vpack.c.bf16 %v364_v7, %v363_v6  ;;  %v366_v11 = vld [vmem:[#allocation6 + $0x38] sm:$0xff]  ;;  %1244 = vmatprep.mubr.f32.mxu0 %v343_v9  ;;  %v367_v13 = vld [vmem:[#allocation6 + $0x40] sm:$0xff]  ;;  %v368_v14 = vld [vmem:[#allocation6 + $0x48] sm:$0xff]  ;;  %p1688_p10 = scmp.ne.s32.totalorder %s2129_s21, %s1687_s11 }
  0x89   : > { %1383 = vmatpush3.bf16.msra.mxu0 %v1380_v3  ;;  %v1392_v12 = vpack.c.bf16 %v366_v11, %v365_v10  ;;  %v575_v15 = vld [vmem:[#allocation8] sm:$0xff]  ;;  %v576_v16 = vld [vmem:[#allocation8 + $0x8] sm:$0xff]  ;;  %v577_v17 = vld [vmem:[#allocation8 + $0x10] sm:$0xff]  ;;  %v1396_v21 = vpack.c.bf16 %v368_v14, %v367_v13 }
  0x8a   : > { %1385 = vmatprep.subr.bf16.mxu0 %v1384_v5  ;;  %v578_v18 = vld [vmem:[#allocation8 + $0x18] sm:$0xff]  ;;  %v1412_v19 = vpack.c.bf16 %v576_v16, %v575_v15  ;;  %v579_v22 = vld [vmem:[#allocation8 + $0x20] sm:$0xff]  ;;  %v580_v23 = vld [vmem:[#allocation8 + $0x28] sm:$0xff]  ;;  %p1689_p3 = pnand %p1688_p10, %p1966_p5 }
  0x8b   : > { %v1416_v20 = vpack.c.bf16 %v578_v18, %v577_v17  ;;  %v369_v24 = vld [vmem:[#allocation6 + $0x50] sm:$0xff]  ;;  %v370_v25 = vld [vmem:[#allocation6 + $0x58] sm:$0xff]  ;;  %v1420_v26 = vpack.c.bf16 %v580_v23, %v579_v22  ;;  %v371_v30 = vld [vmem:[#allocation6 + $0x60] sm:$0xff] }
  0x8c   : > { %1413 = vmatprep.subr.bf16.mxu1 %v1412_v19  ;;  %v1400_v27 = vpack.c.bf16 %v370_v25, %v369_v24  ;;  %v581_v28 = vld [vmem:[#allocation8 + $0x30] sm:$0xff]  ;;  %v582_v29 = vld [vmem:[#allocation8 + $0x38] sm:$0xff]  ;;  %v372_v31 = vld [vmem:[#allocation6 + $0x68] sm:$0xff]  ;;  %p1690_p7 = pneg %p1689_p3 }
  0x8d   : > { %1387 = vmatpush3.bf16.msra.mxu0 %v1384_v5  ;;  %1415 = vmatpush3.bf16.msra.mxu1 %v1412_v19  ;;  %v1424_v32 = vpack.c.bf16 %v582_v29, %v581_v28  ;;  %v1404_v33 = vpack.c.bf16 %v372_v31, %v371_v30  ;;  %v583_v34 = vld [vmem:[#allocation8 + $0x40] sm:$0xff]  ;;  %v584_v35 = vld [vmem:[#allocation8 + $0x48] sm:$0xff]  ;;  %v373_v36 = vld [vmem:[#allocation6 + $0x70] sm:$0xff] }
  0x8e   : > { %1389 = vmatprep.subr.bf16.mxu0 %v1388_v8  ;;  %1417 = vmatprep.subr.bf16.mxu1 %v1416_v20  ;;  %v374_v37 = vld [vmem:[#allocation6 + $0x78] sm:$0xff]  ;;  %v1428_v38 = vpack.c.bf16 %v584_v35, %v583_v34  ;;  %v585_v40 = vld [vmem:[#allocation8 + $0x50] sm:$0xff]  ;;  %v587_v43 = vld [vmem:[#allocation8 + $0x60] sm:$0xff] }
  0x8f   : > { %v1408_v39 = vpack.c.bf16 %v374_v37, %v373_v36  ;;  %v586_v41 = vld [vmem:[#allocation8 + $0x58] sm:$0xff]  ;;  %v588_v44 = vld [vmem:[#allocation8 + $0x68] sm:$0xff]  ;;  %v345_v47 = vld [vmem:[%s2023_s8 + $0x10] sm:$0xff] }
  0x90   : > { %v1432_v42 = vpack.c.bf16 %v586_v41, %v585_v40  ;;  %v344_v45 = vld [vmem:[%s2023_s8 + $0x8] sm:$0xff]  ;;  %v1436_v46 = vpack.c.bf16 %v588_v44, %v587_v43  ;;  %v346_v48 = vld [vmem:[%s2023_s8 + $0x18] sm:$0xff]  ;;  %v347_v49 = vld [vmem:[%s2023_s8 + $0x20] sm:$0xff] }
  0x91   : > { %1391 = vmatpush3.bf16.msra.mxu0 %v1388_v8  ;;  %1419 = vmatpush3.bf16.msra.mxu1 %v1416_v20  ;;  %v348_v50 = vld [vmem:[%s2023_s8 + $0x28] sm:$0xff]  ;;  %v349_v51 = vld [vmem:[%s2023_s8 + $0x30] sm:$0xff]  ;;  %v350_v52 = vld [vmem:[%s2023_s8 + $0x38] sm:$0xff] }
  0x92   : > { %1393 = vmatprep.subr.bf16.mxu0 %v1392_v12  ;;  %1421 = vmatprep.subr.bf16.mxu1 %v1420_v26  ;;  %v351_v53 = vld [vmem:[%s2023_s8 + $0x40] sm:$0xff]  ;;  %v352_v54 = vld [vmem:[%s2023_s8 + $0x48] sm:$0xff]  ;;  %v353_v55 = vld [vmem:[%s2023_s8 + $0x50] sm:$0xff] }
  0x93   : > { %v354_v56 = vld [vmem:[%s2023_s8 + $0x58] sm:$0xff]  ;;  %v355_v57 = vld [vmem:[%s2023_s8 + $0x60] sm:$0xff]  ;;  %v356_v58 = vld [vmem:[%s2023_s8 + $0x68] sm:$0xff] }
  0x94   : > { %v357_v59 = vld [vmem:[%s2023_s8 + $0x70] sm:$0xff]  ;;  %v358_v60 = vld [vmem:[%s2023_s8 + $0x78] sm:$0xff]  ;;  %v791_v0 = vld [vmem:[#allocation9] sm:$0xff]  ;;  %s1769_s8 = smov [#allocation11]  }
  0x95   : > { %1395 = vmatpush3.bf16.msra.mxu0 %v1392_v12  ;;  %1423 = vmatpush3.bf16.msra.mxu1 %v1420_v26  ;;  %v589_v61 = vld [vmem:[#allocation8 + $0x70] sm:$0xff]  ;;  %v590_v62 = vld [vmem:[#allocation8 + $0x78] sm:$0xff]  ;;  %v792_v1 = vld [vmem:[#allocation9 + $0x8] sm:$0xff]  ;;  %s1691_s30 = sshll.u32 %s1769_s8, 4  ;;  %s1692_s30 = int_to_ptr.vmem [resolvable:$false] %s1691_s30 }
  0x96   : > { %1397 = vmatprep.subr.bf16.mxu0 %v1396_v21  ;;  %1425 = vmatprep.subr.bf16.mxu1 %v1424_v32  ;;  %v1440_v63 = vpack.c.bf16 %v590_v62, %v589_v61  ;;  %v793_v2 = vld [vmem:[#allocation9 + $0x10] sm:$0xff]  ;;  %v1444_v3 = vpack.c.bf16 %v792_v1, %v791_v0  ;;  %v794_v4 = vld [vmem:[#allocation9 + $0x18] sm:$0xff]  ;;  %v795_v6 = vld [vmem:[#allocation9 + $0x20] sm:$0xff]  ;;  %s1693_s9 = scalar_lea.vmem %s1692_s30, 4096  ;;  %p1694_p12 = scmp.lt.s32.totalorder %s2129_s21, %s1692_s30 }
  0x97   : > { %v1448_v5 = vpack.c.bf16 %v794_v4, %v793_v2  ;;  %v796_v7 = vld [vmem:[#allocation9 + $0x28] sm:$0xff]  ;;  %v797_v9 = vld [vmem:[#allocation9 + $0x30] sm:$0xff]  ;;  %v798_v10 = vld [vmem:[#allocation9 + $0x38] sm:$0xff]  ;;  %p1695_p1 = scmp.lt.s32.totalorder %s1693_s9, %s1687_s11 }
  0x98   : > { %v1452_v8 = vpack.c.bf16 %v796_v7, %v795_v6  ;;  %v2053_v11 = vpack.c.bf16 %v798_v10, %v797_v9  ;;  %v799_v12 = vld [vmem:[#allocation9 + $0x40] sm:$0xff]  ;;  %v800_v13 = vld [vmem:[#allocation9 + $0x48] sm:$0xff]  ;;  %v801_v15 = vld [vmem:[#allocation9 + $0x50] sm:$0xff] }
  0x99   : > { %1399 = vmatpush3.bf16.msra.mxu0 %v1396_v21  ;;  %1427 = vmatpush3.bf16.msra.mxu1 %v1424_v32  ;;  %v2056_v14 = vpack.c.bf16 %v800_v13, %v799_v12  ;;  %v802_v16 = vld [vmem:[#allocation9 + $0x58] sm:$0xff]  ;;  %v803_v18 = vld [vmem:[#allocation9 + $0x60] sm:$0xff]  ;;  %v804_v19 = vld [vmem:[#allocation9 + $0x68] sm:$0xff]  ;;  %p1696_p2 = por %p1695_p1, %p1694_p12 }
  0x9a   : > { %1401 = vmatprep.subr.bf16.mxu0 %v1400_v27  ;;  %1429 = vmatprep.subr.bf16.mxu1 %v1428_v38  ;;  %v2060_v17 = vpack.c.bf16 %v802_v16, %v801_v15  ;;  %v2064_v20 = vpack.c.bf16 %v804_v19, %v803_v18  ;;  %v2072_v21 = vld [vmem:[%s2177_s2] ss:$0 sm:$0xff]  ;;  %v805_v6 = vld [vmem:[#allocation9 + $0x70] sm:$0xff]  ;;  %v806_v7 = vld [vmem:[#allocation9 + $0x78] sm:$0xff] }
  0x9b   : > { %v1107_v9 = vld [vmem:[%s2179_s4] ss:$0 sm:$0xff]  ;;  %p1697_p4 = pnand %p1696_p2, %p1690_p7 }
  0x9d   : > { %1403 = vmatpush3.bf16.msra.mxu0 %v1400_v27  ;;  %1431 = vmatpush3.bf16.msra.mxu1 %v1428_v38 }
  0x9e   : > { %1405 = vmatprep.subr.bf16.mxu0 %v1404_v33  ;;  %1433 = vmatprep.subr.bf16.mxu1 %v1432_v42 }
  0xa1   : > { %1407 = vmatpush3.bf16.msra.mxu0 %v1404_v33  ;;  %1435 = vmatpush3.bf16.msra.mxu1 %v1432_v42 }
  0xa2   : > { %1409 = vmatprep.subr.bf16.mxu0 %v1408_v39  ;;  %1437 = vmatprep.subr.bf16.mxu1 %v1436_v46 }
  0xa5   : > { %1411 = vmatpush3.bf16.msra.mxu0 %v1408_v39  ;;  %1439 = vmatpush3.bf16.msra.mxu1 %v1436_v46 }
  0xa6   : > { %1441 = vmatprep.subr.bf16.mxu1 %v1440_v63  ;;  %1445 = vmatprep.subr.bf16.mxu0 %v1444_v3 }
  0xa8   : > { %1245 = vmatmul.mubr.f32.vlgmr.msra.gmra.mrb[0].mxu0 %v344_v45 }
  0xa9   : > { %1247 = vmatprep.mubr.f32.mxu0 %v345_v47  ;;  %1443 = vmatpush3.bf16.msra.mxu1 %v1440_v63 }
  0xaa   : > { %1476 = vmatprep.subr.bf16.mxu1 %v1444_v3  ;;  %1447 = vmatpush3.bf16.msra.mxu0 %v1444_v3 }
  0xab   : > { %1449 = vmatprep.subr.bf16.mxu0 %v1448_v5 }
  0xac   : > { %1248 = vmatmul.mubr.f32.gmra.mrb[2].mxu0 %v346_v48 }
  0xad   : > { %1250 = vmatprep.mubr.f32.mxu0 %v347_v49 }
  0xae   : > { %1451 = vmatpush3.bf16.msra.mxu0 %v1448_v5 }
  0xaf   : > { %1453 = vmatprep.subr.bf16.mxu0 %v1452_v8 }
  0xb0   : > { %1251 = vmatmul.mubr.f32.gmra.mrb[4].mxu0 %v348_v50 }
  0xb1   : > { %1253 = vmatprep.mubr.f32.mxu0 %v349_v51 }
  0xb2   : > { %1455 = vmatpush3.bf16.msra.mxu0 %v1452_v8 }
  0xb3   : > { %1457 = vmatprep.subr.bf16.mxu0 %v2053_v11 }
  0xb4   : > { %1254 = vmatmul.mubr.f32.gmra.mrb[6].mxu0 %v350_v52 }
  0xb5   : > { %1256 = vmatprep.mubr.f32.mxu0 %v351_v53 }
  0xb6   : > { %1459 = vmatpush3.bf16.msra.mxu0 %v2053_v11 }
  0xb7   : > { %1461 = vmatprep.subr.bf16.mxu0 %v2056_v14 }
  0xb8   : > { %1257 = vmatmul.mubr.f32.gmra.mrb[8].mxu0 %v352_v54 }
  0xb9   : > { %1259 = vmatprep.mubr.f32.mxu0 %v353_v55 }
  0xba   : > { %1463 = vmatpush3.bf16.msra.mxu0 %v2056_v14 }
  0xbb   : > { %1465 = vmatprep.subr.bf16.mxu0 %v2060_v17 }
  0xbc   : > { %1260 = vmatmul.mubr.f32.gmra.mrb[10].mxu0 %v354_v56 }
  0xbd   : > { %1262 = vmatprep.mubr.f32.mxu0 %v355_v57 }
  0xbe   : > { %1467 = vmatpush3.bf16.msra.mxu0 %v2060_v17 }
  0xbf   : > { %1469 = vmatprep.subr.bf16.mxu0 %v2064_v20 }
  0xc0   : > { %1263 = vmatmul.mubr.f32.gmra.mrb[12].mxu0 %v356_v58 }
  0xc1   : > { %1265 = vmatprep.mubr.f32.mxu0 %v357_v59 }
  0xc2   : > { %1471 = vmatpush3.bf16.msra.mxu0 %v2064_v20 }
  0xc4   : > { %1266 = vmatmul.mubr.f32.gmra.mrb[14].mxu0 %v358_v60 }
 0x17b   : > { %v1246_v22 = vpop.f32.mrb[0].mxu0 }
 0x17c   : > { %v454_v23 = vadd.f32 %v1246_v22, %v2072_v21  ;;  %v448_v24 = vpop.f32.mrb[1].mxu0 }
 0x17d   : > { %v449_v25 = vadd.f32 %v2072_v21, %v448_v24 }
 0x17e   : > { %v560_v28 = vmax.f32 %v454_v23, 0.0 }
 0x17f   : > { %v1249_v26 = vpop.f32.mrb[2].mxu0  ;;  %v559_v27 = vmax.f32 %v449_v25, 0.0 }
 0x180   : > { %v464_v29 = vadd.f32 %v1249_v26, %v2072_v21  ;;  %v458_v30 = vpop.f32.mrb[3].mxu0 }
 0x181   : > { %v459_v31 = vadd.f32 %v2072_v21, %v458_v30  ;;  %1300 = vmatprep.mubr.f32.mxu1 %v559_v27 }
 0x182   : > { %1301 = vmatmul.mubr.f32.vlgmr.msra.gmra.mrb[0].mxu1 %v560_v28  ;;  %v562_v34 = vmax.f32 %v464_v29, 0.0 }
 0x183   : > { %v561_v32 = vmax.f32 %v459_v31, 0.0  ;;  %v1252_v33 = vpop.f32.mrb[4].mxu0  ;;  %1484 = vmatpush3.bf16.msra.mxu1 %v1444_v3 }
 0x184   : > { %v474_v35 = vadd.f32 %v1252_v33, %v2072_v21  ;;  %v468_v36 = vpop.f32.mrb[5].mxu0  ;;  %1477 = vmatprep.subr.bf16.mxu1 %v1448_v5 }
 0x185   : > { %v469_v37 = vadd.f32 %v2072_v21, %v468_v36  ;;  %1303 = vmatprep.mubr.f32.mxu1 %v561_v32 }
 0x186   : > { %1304 = vmatmul.mubr.f32.gmra.mrb[2].mxu1 %v562_v34  ;;  %v564_v40 = vmax.f32 %v474_v35, 0.0 }
 0x187   : > { %v563_v38 = vmax.f32 %v469_v37, 0.0  ;;  %v1255_v39 = vpop.f32.mrb[6].mxu0  ;;  %1485 = vmatpush3.bf16.msra.mxu1 %v1448_v5 }
 0x188   : > { %v484_v41 = vadd.f32 %v1255_v39, %v2072_v21  ;;  %v478_v42 = vpop.f32.mrb[7].mxu0  ;;  %1478 = vmatprep.subr.bf16.mxu1 %v1452_v8 }
 0x189   : > { %v479_v43 = vadd.f32 %v2072_v21, %v478_v42  ;;  %1306 = vmatprep.mubr.f32.mxu1 %v563_v38 }
 0x18a   : > { %1307 = vmatmul.mubr.f32.gmra.mrb[4].mxu1 %v564_v40  ;;  %v566_v46 = vmax.f32 %v484_v41, 0.0 }
 0x18b   : > { %v565_v44 = vmax.f32 %v479_v43, 0.0  ;;  %v1258_v45 = vpop.f32.mrb[8].mxu0  ;;  %1486 = vmatpush3.bf16.msra.mxu1 %v1452_v8  ;;  %v1472_v8 = vpack.c.bf16 %v806_v7, %v805_v6 }
 0x18c   : > { %v494_v47 = vadd.f32 %v1258_v45, %v2072_v21  ;;  %v488_v48 = vpop.f32.mrb[9].mxu0  ;;  %1479 = vmatprep.subr.bf16.mxu1 %v2053_v11 }
 0x18d   : > { %v489_v49 = vadd.f32 %v2072_v21, %v488_v48  ;;  %1309 = vmatprep.mubr.f32.mxu1 %v565_v44  ;;  %1473 = vmatprep.subr.bf16.mxu0 %v1472_v8 }
 0x18e   : > { %1310 = vmatmul.mubr.f32.gmra.mrb[6].mxu1 %v566_v46  ;;  %v568_v52 = vmax.f32 %v494_v47, 0.0  ;;  %1475 = vmatpush3.bf16.msra.mxu0 %v1472_v8 }
 0x18f   : > { %v567_v50 = vmax.f32 %v489_v49, 0.0  ;;  %v1261_v51 = vpop.f32.mrb[10].mxu0  ;;  %1487 = vmatpush3.bf16.msra.mxu1 %v2053_v11 }
 0x190   : > { %v504_v53 = vadd.f32 %v1261_v51, %v2072_v21  ;;  %v498_v54 = vpop.f32.mrb[11].mxu0  ;;  %1480 = vmatprep.subr.bf16.mxu1 %v2056_v14 }
 0x191   : > { %v499_v55 = vadd.f32 %v2072_v21, %v498_v54  ;;  %1312 = vmatprep.mubr.f32.mxu1 %v567_v50 }
 0x192   : > { %1313 = vmatmul.mubr.f32.gmra.mrb[8].mxu1 %v568_v52  ;;  %v570_v58 = vmax.f32 %v504_v53, 0.0 }
 0x193   : > { %v569_v56 = vmax.f32 %v499_v55, 0.0  ;;  %v1264_v57 = vpop.f32.mrb[12].mxu0  ;;  %1488 = vmatpush3.bf16.msra.mxu1 %v2056_v14 }
 0x194   : > { %v514_v59 = vadd.f32 %v1264_v57, %v2072_v21  ;;  %v508_v60 = vpop.f32.mrb[13].mxu0  ;;  %1481 = vmatprep.subr.bf16.mxu1 %v2060_v17 }
 0x195   : > { %v509_v61 = vadd.f32 %v2072_v21, %v508_v60  ;;  %1315 = vmatprep.mubr.f32.mxu1 %v569_v56 }
 0x196   : > { %1316 = vmatmul.mubr.f32.gmra.mrb[10].mxu1 %v570_v58  ;;  %v572_v0 = vmax.f32 %v514_v59, 0.0  ;;  %v1108_v58 = vld [vmem:[%s2181_s6] ss:$0 sm:$0xff] }
 0x197   : > { %v571_v62 = vmax.f32 %v509_v61, 0.0  ;;  %v1267_v63 = vpop.f32.mrb[14].mxu0  ;;  %1489 = vmatpush3.bf16.msra.mxu1 %v2060_v17 }
 0x198   : > { %v524_v1 = vadd.f32 %v1267_v63, %v2072_v21  ;;  %v518_v2 = vpop.f32.mrb[15].mxu0  ;;  %1482 = vmatprep.subr.bf16.mxu1 %v2064_v20 }
 0x199   : > { %v519_v3 = vadd.f32 %v2072_v21, %v518_v2  ;;  %1318 = vmatprep.mubr.f32.mxu1 %v571_v62 }
 0x19a   : > { %1319 = vmatmul.mubr.f32.gmra.mrb[12].mxu1 %v572_v0  ;;  %v574_v5 = vmax.f32 %v524_v1, 0.0 }
 0x19b   : > { %v573_v4 = vmax.f32 %v519_v3, 0.0  ;;  %1490 = vmatpush3.bf16.msra.mxu1 %v2064_v20 }
 0x19c   : > { %1483 = vmatprep.subr.bf16.mxu1 %v1472_v8 }
 0x19d   : > { %1321 = vmatprep.mubr.f32.mxu1 %v573_v4 }
 0x19e   : > { %1322 = vmatmul.mubr.f32.gmra.mrb[14].mxu1 %v574_v5 }
 0x19f   : > { %1491 = vmatpush3.bf16.msra.mxu1 %v1472_v8 }
 0x255   : > { %v1302_v10 = vpop.f32.mrb[0].mxu1 }
 0x256   : > { %v670_v11 = vadd.f32 %v1302_v10, %v1107_v9  ;;  %v664_v12 = vpop.f32.mrb[1].mxu1 }
 0x257   : > { %v665_v13 = vadd.f32 %v1107_v9, %v664_v12 }
 0x258   : > { %v776_v16 = vmax.f32 %v670_v11, 0.0 }
 0x259   : > { %v775_v14 = vmax.f32 %v665_v13, 0.0  ;;  %v1305_v15 = vpop.f32.mrb[2].mxu1 }
 0x25a   : > { %v680_v17 = vadd.f32 %v1305_v15, %v1107_v9  ;;  %v674_v18 = vpop.f32.mrb[3].mxu1 }
 0x25b   : > { %v675_v19 = vadd.f32 %v1107_v9, %v674_v18  ;;  %1356 = vmatprep.mubr.f32.mxu0 %v775_v14 }
 0x25c   : > { %1357 = vmatmul.mubr.f32.vlgmr.msra.gmra.mrb[16].mxu0 %v776_v16  ;;  %v778_v22 = vmax.f32 %v680_v17, 0.0 }
 0x25d   : > { %v777_v20 = vmax.f32 %v675_v19, 0.0  ;;  %v1308_v21 = vpop.f32.mrb[4].mxu1 }
 0x25e   : > { %v690_v23 = vadd.f32 %v1308_v21, %v1107_v9  ;;  %v684_v24 = vpop.f32.mrb[5].mxu1 }
 0x25f   : > { %v685_v25 = vadd.f32 %v1107_v9, %v684_v24  ;;  %1359 = vmatprep.mubr.f32.mxu0 %v777_v20 }
 0x260   : > { %1360 = vmatmul.mubr.f32.gmra.mrb[18].mxu0 %v778_v22  ;;  %v780_v28 = vmax.f32 %v690_v23, 0.0 }
 0x261   : > { %v779_v26 = vmax.f32 %v685_v25, 0.0  ;;  %v1311_v27 = vpop.f32.mrb[6].mxu1 }
 0x262   : > { %v700_v29 = vadd.f32 %v1311_v27, %v1107_v9  ;;  %v694_v30 = vpop.f32.mrb[7].mxu1 }
 0x263   : > { %v695_v31 = vadd.f32 %v1107_v9, %v694_v30  ;;  %1362 = vmatprep.mubr.f32.mxu0 %v779_v26 }
 0x264   : > { %1363 = vmatmul.mubr.f32.gmra.mrb[20].mxu0 %v780_v28  ;;  %v782_v34 = vmax.f32 %v700_v29, 0.0 }
 0x265   : > { %v781_v32 = vmax.f32 %v695_v31, 0.0  ;;  %v1314_v33 = vpop.f32.mrb[8].mxu1 }
 0x266   : > { %v710_v35 = vadd.f32 %v1314_v33, %v1107_v9  ;;  %v704_v36 = vpop.f32.mrb[9].mxu1 }
 0x267   : > { %v705_v37 = vadd.f32 %v1107_v9, %v704_v36  ;;  %1365 = vmatprep.mubr.f32.mxu0 %v781_v32 }
 0x268   : > { %1366 = vmatmul.mubr.f32.gmra.mrb[22].mxu0 %v782_v34  ;;  %v784_v40 = vmax.f32 %v710_v35, 0.0 }
 0x269   : > { %v783_v38 = vmax.f32 %v705_v37, 0.0  ;;  %v1317_v39 = vpop.f32.mrb[10].mxu1 }
 0x26a   : > { %v720_v41 = vadd.f32 %v1317_v39, %v1107_v9  ;;  %v714_v42 = vpop.f32.mrb[11].mxu1 }
 0x26b   : > { %v715_v43 = vadd.f32 %v1107_v9, %v714_v42  ;;  %1368 = vmatprep.mubr.f32.mxu1 %v783_v38 }
 0x26c   : > { %1369 = vmatmul.mubr.f32.vlgmr.msra.gmra.mrb[16].mxu1 %v784_v40  ;;  %v786_v46 = vmax.f32 %v720_v41, 0.0 }
 0x26d   : > { %v785_v44 = vmax.f32 %v715_v43, 0.0  ;;  %v1320_v45 = vpop.f32.mrb[12].mxu1 }
 0x26e   : > { %v730_v47 = vadd.f32 %v1320_v45, %v1107_v9  ;;  %v724_v48 = vpop.f32.mrb[13].mxu1 }
 0x26f   : > { %v725_v49 = vadd.f32 %v1107_v9, %v724_v48  ;;  %1371 = vmatprep.mubr.f32.mxu1 %v785_v44 }
 0x270   : > { %1372 = vmatmul.mubr.f32.gmra.mrb[18].mxu1 %v786_v46  ;;  %v788_v52 = vmax.f32 %v730_v47, 0.0 }
 0x271   : > { %v787_v50 = vmax.f32 %v725_v49, 0.0  ;;  %v1323_v51 = vpop.f32.mrb[14].mxu1 }
 0x272   : > { %v740_v53 = vadd.f32 %v1323_v51, %v1107_v9  ;;  %v734_v54 = vpop.f32.mrb[15].mxu1 }
 0x273   : > { %v735_v55 = vadd.f32 %v1107_v9, %v734_v54  ;;  %1374 = vmatprep.mubr.f32.mxu1 %v787_v50 }
 0x274   : > { %1375 = vmatmul.mubr.f32.gmra.mrb[20].mxu1 %v788_v52  ;;  %v790_v57 = vmax.f32 %v740_v53, 0.0 }
 0x275   : > { %v789_v56 = vmax.f32 %v735_v55, 0.0 }
 0x277   : > { %1377 = vmatprep.mubr.f32.mxu1 %v789_v56 }
 0x278   : > { %1378 = vmatmul.mubr.f32.gmra.mrb[22].mxu1 %v790_v57 }
 0x32f   : > { %v1358_v59 = vpop.f32.mrb[16].mxu0 }
 0x330   : > { %v886_v60 = vadd.f32 %v1358_v59, %v1108_v58  ;;  %v880_v61 = vpop.f32.mrb[17].mxu0 }
 0x331   : > { %v881_v62 = vadd.f32 %v1108_v58, %v880_v61 }
 0x332   : > { %960 = vst [vmem:[%s2106_s12 + $0x8] sm:$0xff] %v886_v60 }
 0x333   : > { %959 = vst [vmem:[%s2106_s12] sm:$0xff] %v881_v62  ;;  %v1361_v63 = vpop.f32.mrb[18].mxu0 }
 0x334   : > { %v896_v0 = vadd.f32 %v1361_v63, %v1108_v58  ;;  %v890_v1 = vpop.f32.mrb[19].mxu0 }
 0x335   : > { %v891_v2 = vadd.f32 %v1108_v58, %v890_v1 }
 0x336   : > { %962 = vst [vmem:[%s2106_s12 + $0x18] sm:$0xff] %v896_v0 }
 0x337   : > { %961 = vst [vmem:[%s2106_s12 + $0x10] sm:$0xff] %v891_v2  ;;  %v1364_v3 = vpop.f32.mrb[20].mxu0 }
 0x338   : > { %v906_v4 = vadd.f32 %v1364_v3, %v1108_v58  ;;  %v900_v5 = vpop.f32.mrb[21].mxu0 }
 0x339   : > { %v901_v6 = vadd.f32 %v1108_v58, %v900_v5 }
 0x33a   : > { %964 = vst [vmem:[%s2106_s12 + $0x28] sm:$0xff] %v906_v4 }
 0x33b   : > { %963 = vst [vmem:[%s2106_s12 + $0x20] sm:$0xff] %v901_v6  ;;  %v1367_v7 = vpop.f32.mrb[22].mxu0 }
 0x33c   : > { %v916_v8 = vadd.f32 %v1367_v7, %v1108_v58  ;;  %v910_v9 = vpop.f32.mrb[23].mxu0 }
 0x33d   : > { %v911_v10 = vadd.f32 %v1108_v58, %v910_v9 }
 0x33e   : > { %966 = vst [vmem:[%s2106_s12 + $0x38] sm:$0xff] %v916_v8 }
 0x33f   : > { %965 = vst [vmem:[%s2106_s12 + $0x30] sm:$0xff] %v911_v10  ;;  %v1370_v11 = vpop.f32.mrb[16].mxu1 }
 0x340   : > { %v926_v12 = vadd.f32 %v1370_v11, %v1108_v58  ;;  %v920_v13 = vpop.f32.mrb[17].mxu1 }
 0x341   : > { %v921_v14 = vadd.f32 %v1108_v58, %v920_v13 }
 0x342   : > { %968 = vst [vmem:[%s2106_s12 + $0x48] sm:$0xff] %v926_v12 }
 0x343   : > { %967 = vst [vmem:[%s2106_s12 + $0x40] sm:$0xff] %v921_v14  ;;  %v1373_v15 = vpop.f32.mrb[18].mxu1 }
 0x344   : > { %v936_v16 = vadd.f32 %v1373_v15, %v1108_v58  ;;  %v930_v17 = vpop.f32.mrb[19].mxu1 }
 0x345   : > { %v931_v18 = vadd.f32 %v1108_v58, %v930_v17 }
 0x346   : > { %970 = vst [vmem:[%s2106_s12 + $0x58] sm:$0xff] %v936_v16 }
 0x347   : > { %969 = vst [vmem:[%s2106_s12 + $0x50] sm:$0xff] %v931_v18  ;;  %v1376_v19 = vpop.f32.mrb[20].mxu1 }
 0x348   : > { %v946_v20 = vadd.f32 %v1376_v19, %v1108_v58  ;;  %v940_v21 = vpop.f32.mrb[21].mxu1 }
 0x349   : > { %v941_v22 = vadd.f32 %v1108_v58, %v940_v21 }
 0x34a   : > { %972 = vst [vmem:[%s2106_s12 + $0x68] sm:$0xff] %v946_v20 }
 0x34b   : > { %971 = vst [vmem:[%s2106_s12 + $0x60] sm:$0xff] %v941_v22  ;;  %v1379_v23 = vpop.f32.mrb[22].mxu1 }
 0x34c   : > { %v956_v24 = vadd.f32 %v1379_v23, %v1108_v58  ;;  %v950_v25 = vpop.f32.mrb[23].mxu1 }
 0x34d   : > { %v951_v26 = vadd.f32 %v1108_v58, %v950_v25 }
 0x34e   : > { %974 = vst [vmem:[%s2106_s12 + $0x78] sm:$0xff] %v956_v24 }
 0x34f   : > { %973 = vst [vmem:[%s2106_s12 + $0x70] sm:$0xff] %v951_v26 }
 0x350   : > { %1700 = shalt.err (!%p1697_p4)
}
 0x351   : > { %s1701_s13 = scalar_lea.hbm %s2127_s23, 2048  ;;  %s1705_s14 = scalar_lea.hbm %s2182_s7, 4096 }
 0x352   : > { %p1702_p9 = scmp.ne.s32.totalorder %s2127_s23, %s1701_s13  ;;  %p1706_p8 = scmp.lt.u32.totalorder %s2127_s23, %s2182_s7 }
 0x353   : > { %p1707_p13 = scmp.lt.u32.totalorder %s1705_s14, %s1701_s13  ;;  %p1709_p10 = scmp.lt.u32.totalorder %s1701_s13, %s2127_s23 }
 0x354   : > { %p1703_p0 = pnand %p1702_p9, %p1966_p5 }
 0x355   : > { %p1708_p6 = por %p1707_p13, %p1706_p8 }
 0x356   : > { %p1704_p11 = pneg %p1703_p0 }
 0x357   : > { %p1710_p3 = por %p1709_p10, %p1708_p6 }
 0x359   : > { %p1711_p7 = pnand %p1710_p3, %p1704_p11 }
 0x35b   : > { %1714 = shalt.err (!%p1711_p7)
}
 0x35c   : > { %s1770_s16 = smov 128   ;;  %s1771_s29 = smov 8  }
 0x35d   : > { %1506 = dma.vmem_to_hbm [thread:$0]  (%p1966_p5), %s2129_s21, 2048, %s2127_s23, %s976_s28, %s1770_s16, %s1770_s16, %s1771_s29  }
 0x35e PF: > { %s2202_s11 = sld [smem:[#allocation16_spill]]  ;;  %s1004_s8 = sand.u32 1, %s1749_s24  }
 0x35f   : > { %p2204_p1 = scmp.ge.s32.totalorder %s1761_s27, 2  ;;  %s1005_s30 = scalar_lea.sflag [#allocation5], %s1004_s8 }
 0x364   : > { %p2203_p12 = scmp.ne.s32.totalorder %s2202_s11, 0 }
 0x366   : > { %p1523_p2 = pnand %p2204_p1, %p2203_p12 }
 0x368   : > { %1744 = dma.done.wait (!%p1523_p2), %s1005_s30, 2048  }
 0x369   : > { %1746 = vsyncadd (!%p1523_p2), %s1005_s30, 4294965248  ;;  %p22_p4 = scmp.ge.s32.totalorder %s1952_s22, 4   ;;  %s2205_s24 = smov %s1753_s25 }
 0x36a   : > { %s2206_s25 = smov %s1757_s26  ;;  %s2207_s26 = smov %s1962_s18 }
 0x36b   : > { %s2208_s27 = smov %s1952_s22  ;;  %24 = sbr.rel (!%p22_p4) target bundleno = 7 (0x7), region = 105 }
 0x372   :  { %1010 = vsyncpa [#allocation4], 1 }
 0x373   :  { %1012 = vsyncpa [#allocation4 + $0x1], 1 }
 0x374   :  { %1013 = vsyncpa [#allocation7], 1 }
 0x375   :  { %1014 = vsyncpa [#allocation10], 1 }
 0x376   :  { %1015 = vsyncpa [#allocation5], 1 }
 0x377   :  { %1017 = vsyncpa [#allocation5 + $0x1], 1 }

</bundles_post_ra>
